<compile_context>
chip_gen: v7x
topology: tpu7x:2x2x1
jax: 0.10.0
libtpu: 0.0.40
codegen_flags: <defaults>
</compile_context>

<pallas_src>
import jax
import jax.numpy as jnp
from jax.experimental import pallas as pl
from jax.experimental.pallas import tpu as pltpu


def _count_predictor_kernel(seq_len, batch_pad, hidden_size):
    S, Bp, H = seq_len, batch_pad, hidden_size

    def kernel(x_ref,                       # (S*Bp, I)  time-major, flattened
               wih1_ref, whh1_ref, b1_ref,  # (I, 4H), (H, 4H), (1, 4H)  (i,f,o,g)
               wih2_ref, whh2_ref, b2_ref,  # (H, 4H), (H, 4H), (1, 4H)  (i,f,o,g)
               wfc_ref, bfc_ref,            # (1, H),  (1, 1)
               out_ref,                     # (Bp, 1)
               gx_ref):                     # VMEM scratch (S*Bp, 4H)
        # Pre-pass (off the recurrence): layer-1 input gates for every step as
        # one lane-dense matmul into VMEM scratch.
        gx_ref[...] = (jnp.dot(x_ref[...], wih1_ref[...],
                               preferred_element_type=jnp.float32)
                       + b1_ref[...])

        # Hoist the recurrent weights into values once (kept in vregs).
        whh1 = whh1_ref[...]
        wih2 = wih2_ref[...]
        whh2 = whh2_ref[...]
        b2 = b2_ref[...]

        def lstm_gates(pre, c_prev):
            # Gate layout is (i, f, o, g): sigmoid gates are one contiguous
            # 3H slab -> 2 EUP issues (sigmoid + tanh) instead of 4.
            sig = jax.nn.sigmoid(pre[:, :3 * H])
            i_g = sig[:, 0 * H:1 * H]
            f_g = sig[:, 1 * H:2 * H]
            o_g = sig[:, 2 * H:3 * H]
            g_g = jnp.tanh(pre[:, 3 * H:4 * H])
            c_new = f_g * c_prev + i_g * g_g
            h_new = o_g * jnp.tanh(c_new)
            return h_new, c_new

        def step(t, carry):
            h1, c1, h2, c2 = carry
            off = pl.multiple_of(t * Bp, Bp)
            # Layer 1: precomputed input gates + recurrent matmul only.
            pre1 = gx_ref[pl.ds(off, Bp), :] + jnp.dot(
                h1, whh1, preferred_element_type=jnp.float32)
            h1, c1 = lstm_gates(pre1, c1)
            # Layer 2: two independent matmuls (h2@whh2 depends only on the
            # previous step; next step's layer 1 depends only on h1), so this
            # whole branch overlaps off the critical path after unrolling.
            pre2 = (jnp.dot(h1, wih2, preferred_element_type=jnp.float32)
                    + jnp.dot(h2, whh2, preferred_element_type=jnp.float32)
                    + b2)
            h2, c2 = lstm_gates(pre2, c2)
            return (h1, c1, h2, c2)

        z = jnp.zeros((Bp, H), jnp.float32)
        unroll = True if S <= 32 else 8
        _, _, h2_final, _ = jax.lax.fori_loop(
            0, S, step, (z, z, z, z), unroll=unroll)

        # Linear head as VPU multiply + lane reduce (no width-1 MXU matmul).
        out_ref[...] = (jnp.sum(h2_final * wfc_ref[...], axis=-1,
                                keepdims=True)
                        + bfc_ref[...])

    return kernel


def _reorder_gates(w):
    """Permute the trailing 4H gate axis from PyTorch (i,f,g,o) to (i,f,o,g)."""
    H = w.shape[-1] // 4
    return jnp.concatenate(
        [w[..., :2 * H], w[..., 3 * H:4 * H], w[..., 2 * H:3 * H]], axis=-1)


def count_predictor_forward(x, params, hidden_size):
    """x: (B,S,I) | (B,I) | (I,) float32 (PyTorch layouts). Returns (B,) f32."""
    # Mirror CountPredictor.forward's dim handling.
    if x.ndim == 1:
        x = x[None, None, :]
    elif x.ndim == 2:
        x = x[:, None, :]
    B, S, I = x.shape
    H = hidden_size
    wih1, whh1, b1, wih2, whh2, b2, wfc, bfc = params

    # Re-order gate columns once so the sigmoid gates are contiguous in-kernel.
    wih1, whh1, b1 = map(_reorder_gates, (wih1, whh1, b1))
    wih2, whh2, b2 = map(_reorder_gates, (wih2, whh2, b2))

    # Pad batch (sublane axis) to a multiple of 8, flatten time-major.
    Bp = ((B + 7) // 8) * 8
    x_tm = jnp.transpose(x, (1, 0, 2))                  # (S, B, I)
    if Bp != B:
        x_tm = jnp.pad(x_tm, ((0, 0), (0, Bp - B), (0, 0)))
    x_flat = x_tm.reshape(S * Bp, I)                    # (S*Bp, I)

    vmem = pl.BlockSpec(memory_space=pltpu.MemorySpace.VMEM)
    out = pl.pallas_call(
        _count_predictor_kernel(S, Bp, H),
        out_shape=jax.ShapeDtypeStruct((Bp, 1), jnp.float32),
        in_specs=[vmem] * 9,
        out_specs=vmem,
        scratch_shapes=[pltpu.VMEM((S * Bp, 4 * H), jnp.float32)],
    )(x_flat, wih1, whh1, b1, wih2, whh2, b2, wfc, bfc)

    return out[:B, 0]                                   # drop padding, squeeze


def init_params(key, input_size, hidden_size):
    """Deterministic init matching nn.LSTM / nn.Linear shapes.

    PyTorch stores weight_ih_l{k}: (4H, in), weight_hh_l{k}: (4H, H),
    bias_*: (4H,), fc.weight: (1, H), fc.bias: (1,).  LSTM weights are
    pre-transposed to (in, 4H)/(H, 4H); the two LSTM biases per layer are
    merged; fc.weight is kept as a (1, H) row for the VPU-reduce head.
    Gate order here is the PyTorch (i, f, g, o).
    """
    H, I = hidden_size, input_size
    ks = jax.random.split(key, 10)
    s = 1.0 / jnp.sqrt(H)
    u = lambda k, shape: jax.random.uniform(k, shape, jnp.float32, -s, s)

    wih1 = u(ks[0], (I, 4 * H))
    whh1 = u(ks[1], (H, 4 * H))
    b1 = u(ks[2], (1, 4 * H)) + u(ks[3], (1, 4 * H))    # bias_ih_l0 + bias_hh_l0
    wih2 = u(ks[4], (H, 4 * H))
    whh2 = u(ks[5], (H, 4 * H))
    b2 = u(ks[6], (1, 4 * H)) + u(ks[7], (1, 4 * H))
    wfc = u(ks[8], (1, H))
    bfc = u(ks[9], (1, 1))
    return (wih1, whh1, b1, wih2, whh2, b2, wfc, bfc)


def reference_forward(x, params, hidden_size):
    """Pure-JAX reference of the same forward (PyTorch gate order)."""
    H = hidden_size
    wih1, whh1, b1, wih2, whh2, b2, wfc, bfc = params
    B, S, I = x.shape
    h1 = c1 = h2 = c2 = jnp.zeros((B, H), jnp.float32)

    def cell(x_in, h, c, wih, whh, b):
        g = x_in @ wih + h @ whh + b
        i_g = jax.nn.sigmoid(g[:, 0 * H:1 * H])
        f_g = jax.nn.sigmoid(g[:, 1 * H:2 * H])
        g_g = jnp.tanh(g[:, 2 * H:3 * H])
        o_g = jax.nn.sigmoid(g[:, 3 * H:4 * H])
        c = f_g * c + i_g * g_g
        h = o_g * jnp.tanh(c)
        return h, c

    for t in range(S):
        h1, c1 = cell(x[:, t, :], h1, c1, wih1, whh1, b1)
        h2, c2 = cell(h1, h2, c2, wih2, whh2, b2)
    return jnp.sum(h2 * wfc, axis=-1) + bfc[0, 0]


if __name__ == "__main__":
    batch, seq_len, input_size, hidden_size = 2, 8, 4, 32

    key = jax.random.PRNGKey(0)
    kx, kp = jax.random.split(key)
    x = jax.random.normal(kx, (batch, seq_len, input_size), jnp.float32)
    params = init_params(kp, input_size, hidden_size)

    out = count_predictor_forward(x, params, hidden_size)
    out = jax.block_until_ready(out)

    ref = reference_forward(x, params, hidden_size)
    assert out.shape == (batch,)
    assert jnp.allclose(out, ref, atol=1e-4, rtol=1e-4), (out, ref)

    print("KERNEL_OK")
</pallas_src>

<mosaic_0001>
module attributes {stable_mosaic.version = 11 : i64} {
  func.func @kernel(%arg0: memref<64x4xf32, #tpu.memory_space<vmem>>, %arg1: memref<4x128xf32, #tpu.memory_space<vmem>>, %arg2: memref<32x128xf32, #tpu.memory_space<vmem>>, %arg3: memref<1x128xf32, #tpu.memory_space<vmem>>, %arg4: memref<32x128xf32, #tpu.memory_space<vmem>>, %arg5: memref<32x128xf32, #tpu.memory_space<vmem>>, %arg6: memref<1x128xf32, #tpu.memory_space<vmem>>, %arg7: memref<1x32xf32, #tpu.memory_space<vmem>>, %arg8: memref<1x1xf32, #tpu.memory_space<vmem>>, %arg9: memref<8x1xf32, #tpu.memory_space<vmem>>, %arg10: memref<64x128xf32, #tpu.memory_space<vmem>>) attributes {dimension_semantics = [], scalar_prefetch = 0 : i64, scratch_operands = 1 : i64, tpu.core_type = #tpu.core_type<tc>} {
    %c0 = arith.constant 0 : index
    %c0_0 = arith.constant 0 : index
    %0 = vector.load %arg0[%c0, %c0_0] : memref<64x4xf32, #tpu.memory_space<vmem>>, vector<64x4xf32>
    %c0_1 = arith.constant 0 : index
    %c0_2 = arith.constant 0 : index
    %1 = vector.load %arg1[%c0_1, %c0_2] : memref<4x128xf32, #tpu.memory_space<vmem>>, vector<4x128xf32>
    %cst = arith.constant dense<0.000000e+00> : vector<64x128xf32>
    %2 = tpu.matmul %0, %1, %cst {dimension_numbers = #tpu.dot_dimension_numbers<[1], [0], [0], [1], [0, 0, 1, 1], [], []>} : vector<64x4xf32>, vector<4x128xf32>, vector<64x128xf32> -> vector<64x128xf32>
    %c0_3 = arith.constant 0 : index
    %c0_4 = arith.constant 0 : index
    %3 = vector.load %arg3[%c0_3, %c0_4] : memref<1x128xf32, #tpu.memory_space<vmem>>, vector<1x128xf32>
    %4 = vector.broadcast %3 : vector<1x128xf32> to vector<64x128xf32>
    %5 = arith.addf %2, %4 : vector<64x128xf32>
    %c0_5 = arith.constant 0 : index
    %c0_6 = arith.constant 0 : index
    %6 = vector.load %arg10[%c0_5, %c0_6] : memref<64x128xf32, #tpu.memory_space<vmem>>, vector<64x128xf32>
    tpu.vector_store %arg10[%c0_5, %c0_6], %5 {strides = array<i32>} : memref<64x128xf32, #tpu.memory_space<vmem>>, vector<64x128xf32>,
    %c0_7 = arith.constant 0 : index
    %c0_8 = arith.constant 0 : index
    %7 = vector.load %arg2[%c0_7, %c0_8] : memref<32x128xf32, #tpu.memory_space<vmem>>, vector<32x128xf32>
    %c0_9 = arith.constant 0 : index
    %c0_10 = arith.constant 0 : index
    %8 = vector.load %arg4[%c0_9, %c0_10] : memref<32x128xf32, #tpu.memory_space<vmem>>, vector<32x128xf32>
    %c0_11 = arith.constant 0 : index
    %c0_12 = arith.constant 0 : index
    %9 = vector.load %arg5[%c0_11, %c0_12] : memref<32x128xf32, #tpu.memory_space<vmem>>, vector<32x128xf32>
    %c0_13 = arith.constant 0 : index
    %c0_14 = arith.constant 0 : index
    %10 = vector.load %arg6[%c0_13, %c0_14] : memref<1x128xf32, #tpu.memory_space<vmem>>, vector<1x128xf32>
    %cst_15 = arith.constant 0.000000e+00 : f32
    %11 = vector.broadcast %cst_15 : f32 to vector<8x32xf32>
    %c0_i32 = arith.constant 0 : i32
    %c8_i32 = arith.constant 8 : i32
    %12 = arith.muli %c0_i32, %c8_i32 : i32
    %13 = tpu.assume_multiple %12, 8 : i32
    %14 = arith.index_cast %13 : i32 to index
    %c0_16 = arith.constant 0 : index
    %15 = vector.load %arg10[%14, %c0_16] : memref<64x128xf32, #tpu.memory_space<vmem>>, vector<8x128xf32>
    %cst_17 = arith.constant dense<0.000000e+00> : vector<8x128xf32>
    %16 = tpu.matmul %11, %7, %cst_17 {dimension_numbers = #tpu.dot_dimension_numbers<[1], [0], [0], [1], [0, 0, 1, 1], [], []>} : vector<8x32xf32>, vector<32x128xf32>, vector<8x128xf32> -> vector<8x128xf32>
    %17 = arith.addf %15, %16 : vector<8x128xf32>
    %18 = vector.extract_strided_slice %17 {offsets = [0, 0], sizes = [8, 96], strides = [1, 1]} : vector<8x128xf32> to vector<8x96xf32>
    %19 = arith.negf %18 : vector<8x96xf32>
    %20 = math.exp %19 : vector<8x96xf32>
    %cst_18 = arith.constant 1.000000e+00 : f32
    %21 = vector.broadcast %cst_18 : f32 to vector<8x96xf32>
    %22 = arith.addf %21, %20 : vector<8x96xf32>
    %23 = arith.divf %21, %22 : vector<8x96xf32>
    %24 = vector.extract_strided_slice %23 {offsets = [0, 0], sizes = [8, 32], strides = [1, 1]} : vector<8x96xf32> to vector<8x32xf32>
    %25 = vector.extract_strided_slice %23 {offsets = [0, 32], sizes = [8, 32], strides = [1, 1]} : vector<8x96xf32> to vector<8x32xf32>
    %26 = vector.extract_strided_slice %23 {offsets = [0, 64], sizes = [8, 32], strides = [1, 1]} : vector<8x96xf32> to vector<8x32xf32>
    %27 = vector.extract_strided_slice %17 {offsets = [0, 96], sizes = [8, 32], strides = [1, 1]} : vector<8x128xf32> to vector<8x32xf32>
    %28 = math.tanh %27 : vector<8x32xf32>
    %29 = arith.mulf %25, %11 : vector<8x32xf32>
    %30 = arith.mulf %24, %28 : vector<8x32xf32>
    %31 = arith.addf %29, %30 : vector<8x32xf32>
    %32 = math.tanh %31 : vector<8x32xf32>
    %33 = arith.mulf %26, %32 : vector<8x32xf32>
    %cst_19 = arith.constant dense<0.000000e+00> : vector<8x128xf32>
    %34 = tpu.matmul %33, %8, %cst_19 {dimension_numbers = #tpu.dot_dimension_numbers<[1], [0], [0], [1], [0, 0, 1, 1], [], []>} : vector<8x32xf32>, vector<32x128xf32>, vector<8x128xf32> -> vector<8x128xf32>
    %cst_20 = arith.constant dense<0.000000e+00> : vector<8x128xf32>
    %35 = tpu.matmul %11, %9, %cst_20 {dimension_numbers = #tpu.dot_dimension_numbers<[1], [0], [0], [1], [0, 0, 1, 1], [], []>} : vector<8x32xf32>, vector<32x128xf32>, vector<8x128xf32> -> vector<8x128xf32>
    %36 = arith.addf %34, %35 : vector<8x128xf32>
    %37 = vector.broadcast %10 : vector<1x128xf32> to vector<8x128xf32>
    %38 = arith.addf %36, %37 : vector<8x128xf32>
    %39 = vector.extract_strided_slice %38 {offsets = [0, 0], sizes = [8, 96], strides = [1, 1]} : vector<8x128xf32> to vector<8x96xf32>
    %40 = arith.negf %39 : vector<8x96xf32>
    %41 = math.exp %40 : vector<8x96xf32>
    %cst_21 = arith.constant 1.000000e+00 : f32
    %42 = vector.broadcast %cst_21 : f32 to vector<8x96xf32>
    %43 = arith.addf %42, %41 : vector<8x96xf32>
    %44 = arith.divf %42, %43 : vector<8x96xf32>
    %45 = vector.extract_strided_slice %44 {offsets = [0, 0], sizes = [8, 32], strides = [1, 1]} : vector<8x96xf32> to vector<8x32xf32>
    %46 = vector.extract_strided_slice %44 {offsets = [0, 32], sizes = [8, 32], strides = [1, 1]} : vector<8x96xf32> to vector<8x32xf32>
    %47 = vector.extract_strided_slice %44 {offsets = [0, 64], sizes = [8, 32], strides = [1, 1]} : vector<8x96xf32> to vector<8x32xf32>
    %48 = vector.extract_strided_slice %38 {offsets = [0, 96], sizes = [8, 32], strides = [1, 1]} : vector<8x128xf32> to vector<8x32xf32>
    %49 = math.tanh %48 : vector<8x32xf32>
    %50 = arith.mulf %46, %11 : vector<8x32xf32>
    %51 = arith.mulf %45, %49 : vector<8x32xf32>
    %52 = arith.addf %50, %51 : vector<8x32xf32>
    %53 = math.tanh %52 : vector<8x32xf32>
    %54 = arith.mulf %47, %53 : vector<8x32xf32>
    %c1_i32 = arith.constant 1 : i32
    %c8_i32_22 = arith.constant 8 : i32
    %55 = arith.muli %c1_i32, %c8_i32_22 : i32
    %56 = tpu.assume_multiple %55, 8 : i32
    %57 = arith.index_cast %56 : i32 to index
    %c0_23 = arith.constant 0 : index
    %58 = vector.load %arg10[%57, %c0_23] : memref<64x128xf32, #tpu.memory_space<vmem>>, vector<8x128xf32>
    %cst_24 = arith.constant dense<0.000000e+00> : vector<8x128xf32>
    %59 = tpu.matmul %33, %7, %cst_24 {dimension_numbers = #tpu.dot_dimension_numbers<[1], [0], [0], [1], [0, 0, 1, 1], [], []>} : vector<8x32xf32>, vector<32x128xf32>, vector<8x128xf32> -> vector<8x128xf32>
    %60 = arith.addf %58, %59 : vector<8x128xf32>
    %61 = vector.extract_strided_slice %60 {offsets = [0, 0], sizes = [8, 96], strides = [1, 1]} : vector<8x128xf32> to vector<8x96xf32>
    %62 = arith.negf %61 : vector<8x96xf32>
    %63 = math.exp %62 : vector<8x96xf32>
    %cst_25 = arith.constant 1.000000e+00 : f32
    %64 = vector.broadcast %cst_25 : f32 to vector<8x96xf32>
    %65 = arith.addf %64, %63 : vector<8x96xf32>
    %66 = arith.divf %64, %65 : vector<8x96xf32>
    %67 = vector.extract_strided_slice %66 {offsets = [0, 0], sizes = [8, 32], strides = [1, 1]} : vector<8x96xf32> to vector<8x32xf32>
    %68 = vector.extract_strided_slice %66 {offsets = [0, 32], sizes = [8, 32], strides = [1, 1]} : vector<8x96xf32> to vector<8x32xf32>
    %69 = vector.extract_strided_slice %66 {offsets = [0, 64], sizes = [8, 32], strides = [1, 1]} : vector<8x96xf32> to vector<8x32xf32>
    %70 = vector.extract_strided_slice %60 {offsets = [0, 96], sizes = [8, 32], strides = [1, 1]} : vector<8x128xf32> to vector<8x32xf32>
    %71 = math.tanh %70 : vector<8x32xf32>
    %72 = arith.mulf %68, %31 : vector<8x32xf32>
    %73 = arith.mulf %67, %71 : vector<8x32xf32>
    %74 = arith.addf %72, %73 : vector<8x32xf32>
    %75 = math.tanh %74 : vector<8x32xf32>
    %76 = arith.mulf %69, %75 : vector<8x32xf32>
    %cst_26 = arith.constant dense<0.000000e+00> : vector<8x128xf32>
    %77 = tpu.matmul %76, %8, %cst_26 {dimension_numbers = #tpu.dot_dimension_numbers<[1], [0], [0], [1], [0, 0, 1, 1], [], []>} : vector<8x32xf32>, vector<32x128xf32>, vector<8x128xf32> -> vector<8x128xf32>
    %cst_27 = arith.constant dense<0.000000e+00> : vector<8x128xf32>
    %78 = tpu.matmul %54, %9, %cst_27 {dimension_numbers = #tpu.dot_dimension_numbers<[1], [0], [0], [1], [0, 0, 1, 1], [], []>} : vector<8x32xf32>, vector<32x128xf32>, vector<8x128xf32> -> vector<8x128xf32>
    %79 = arith.addf %77, %78 : vector<8x128xf32>
    %80 = vector.broadcast %10 : vector<1x128xf32> to vector<8x128xf32>
    %81 = arith.addf %79, %80 : vector<8x128xf32>
    %82 = vector.extract_strided_slice %81 {offsets = [0, 0], sizes = [8, 96], strides = [1, 1]} : vector<8x128xf32> to vector<8x96xf32>
    %83 = arith.negf %82 : vector<8x96xf32>
    %84 = math.exp %83 : vector<8x96xf32>
    %cst_28 = arith.constant 1.000000e+00 : f32
    %85 = vector.broadcast %cst_28 : f32 to vector<8x96xf32>
    %86 = arith.addf %85, %84 : vector<8x96xf32>
    %87 = arith.divf %85, %86 : vector<8x96xf32>
    %88 = vector.extract_strided_slice %87 {offsets = [0, 0], sizes = [8, 32], strides = [1, 1]} : vector<8x96xf32> to vector<8x32xf32>
    %89 = vector.extract_strided_slice %87 {offsets = [0, 32], sizes = [8, 32], strides = [1, 1]} : vector<8x96xf32> to vector<8x32xf32>
    %90 = vector.extract_strided_slice %87 {offsets = [0, 64], sizes = [8, 32], strides = [1, 1]} : vector<8x96xf32> to vector<8x32xf32>
    %91 = vector.extract_strided_slice %81 {offsets = [0, 96], sizes = [8, 32], strides = [1, 1]} : vector<8x128xf32> to vector<8x32xf32>
    %92 = math.tanh %91 : vector<8x32xf32>
    %93 = arith.mulf %89, %52 : vector<8x32xf32>
    %94 = arith.mulf %88, %92 : vector<8x32xf32>
    %95 = arith.addf %93, %94 : vector<8x32xf32>
    %96 = math.tanh %95 : vector<8x32xf32>
    %97 = arith.mulf %90, %96 : vector<8x32xf32>
    %c2_i32 = arith.constant 2 : i32
    %c8_i32_29 = arith.constant 8 : i32
    %98 = arith.muli %c2_i32, %c8_i32_29 : i32
    %99 = tpu.assume_multiple %98, 8 : i32
    %100 = arith.index_cast %99 : i32 to index
    %c0_30 = arith.constant 0 : index
    %101 = vector.load %arg10[%100, %c0_30] : memref<64x128xf32, #tpu.memory_space<vmem>>, vector<8x128xf32>
    %cst_31 = arith.constant dense<0.000000e+00> : vector<8x128xf32>
    %102 = tpu.matmul %76, %7, %cst_31 {dimension_numbers = #tpu.dot_dimension_numbers<[1], [0], [0], [1], [0, 0, 1, 1], [], []>} : vector<8x32xf32>, vector<32x128xf32>, vector<8x128xf32> -> vector<8x128xf32>
    %103 = arith.addf %101, %102 : vector<8x128xf32>
    %104 = vector.extract_strided_slice %103 {offsets = [0, 0], sizes = [8, 96], strides = [1, 1]} : vector<8x128xf32> to vector<8x96xf32>
    %105 = arith.negf %104 : vector<8x96xf32>
    %106 = math.exp %105 : vector<8x96xf32>
    %cst_32 = arith.constant 1.000000e+00 : f32
    %107 = vector.broadcast %cst_32 : f32 to vector<8x96xf32>
    %108 = arith.addf %107, %106 : vector<8x96xf32>
    %109 = arith.divf %107, %108 : vector<8x96xf32>
    %110 = vector.extract_strided_slice %109 {offsets = [0, 0], sizes = [8, 32], strides = [1, 1]} : vector<8x96xf32> to vector<8x32xf32>
    %111 = vector.extract_strided_slice %109 {offsets = [0, 32], sizes = [8, 32], strides = [1, 1]} : vector<8x96xf32> to vector<8x32xf32>
    %112 = vector.extract_strided_slice %109 {offsets = [0, 64], sizes = [8, 32], strides = [1, 1]} : vector<8x96xf32> to vector<8x32xf32>
    %113 = vector.extract_strided_slice %103 {offsets = [0, 96], sizes = [8, 32], strides = [1, 1]} : vector<8x128xf32> to vector<8x32xf32>
    %114 = math.tanh %113 : vector<8x32xf32>
    %115 = arith.mulf %111, %74 : vector<8x32xf32>
    %116 = arith.mulf %110, %114 : vector<8x32xf32>
    %117 = arith.addf %115, %116 : vector<8x32xf32>
    %118 = math.tanh %117 : vector<8x32xf32>
    %119 = arith.mulf %112, %118 : vector<8x32xf32>
    %cst_33 = arith.constant dense<0.000000e+00> : vector<8x128xf32>
    %120 = tpu.matmul %119, %8, %cst_33 {dimension_numbers = #tpu.dot_dimension_numbers<[1], [0], [0], [1], [0, 0, 1, 1], [], []>} : vector<8x32xf32>, vector<32x128xf32>, vector<8x128xf32> -> vector<8x128xf32>
    %cst_34 = arith.constant dense<0.000000e+00> : vector<8x128xf32>
    %121 = tpu.matmul %97, %9, %cst_34 {dimension_numbers = #tpu.dot_dimension_numbers<[1], [0], [0], [1], [0, 0, 1, 1], [], []>} : vector<8x32xf32>, vector<32x128xf32>, vector<8x128xf32> -> vector<8x128xf32>
    %122 = arith.addf %120, %121 : vector<8x128xf32>
    %123 = vector.broadcast %10 : vector<1x128xf32> to vector<8x128xf32>
    %124 = arith.addf %122, %123 : vector<8x128xf32>
    %125 = vector.extract_strided_slice %124 {offsets = [0, 0], sizes = [8, 96], strides = [1, 1]} : vector<8x128xf32> to vector<8x96xf32>
    %126 = arith.negf %125 : vector<8x96xf32>
    %127 = math.exp %126 : vector<8x96xf32>
    %cst_35 = arith.constant 1.000000e+00 : f32
    %128 = vector.broadcast %cst_35 : f32 to vector<8x96xf32>
    %129 = arith.addf %128, %127 : vector<8x96xf32>
    %130 = arith.divf %128, %129 : vector<8x96xf32>
    %131 = vector.extract_strided_slice %130 {offsets = [0, 0], sizes = [8, 32], strides = [1, 1]} : vector<8x96xf32> to vector<8x32xf32>
    %132 = vector.extract_strided_slice %130 {offsets = [0, 32], sizes = [8, 32], strides = [1, 1]} : vector<8x96xf32> to vector<8x32xf32>
    %133 = vector.extract_strided_slice %130 {offsets = [0, 64], sizes = [8, 32], strides = [1, 1]} : vector<8x96xf32> to vector<8x32xf32>
    %134 = vector.extract_strided_slice %124 {offsets = [0, 96], sizes = [8, 32], strides = [1, 1]} : vector<8x128xf32> to vector<8x32xf32>
    %135 = math.tanh %134 : vector<8x32xf32>
    %136 = arith.mulf %132, %95 : vector<8x32xf32>
    %137 = arith.mulf %131, %135 : vector<8x32xf32>
    %138 = arith.addf %136, %137 : vector<8x32xf32>
    %139 = math.tanh %138 : vector<8x32xf32>
    %140 = arith.mulf %133, %139 : vector<8x32xf32>
    %c3_i32 = arith.constant 3 : i32
    %c8_i32_36 = arith.constant 8 : i32
    %141 = arith.muli %c3_i32, %c8_i32_36 : i32
    %142 = tpu.assume_multiple %141, 8 : i32
    %143 = arith.index_cast %142 : i32 to index
    %c0_37 = arith.constant 0 : index
    %144 = vector.load %arg10[%143, %c0_37] : memref<64x128xf32, #tpu.memory_space<vmem>>, vector<8x128xf32>
    %cst_38 = arith.constant dense<0.000000e+00> : vector<8x128xf32>
    %145 = tpu.matmul %119, %7, %cst_38 {dimension_numbers = #tpu.dot_dimension_numbers<[1], [0], [0], [1], [0, 0, 1, 1], [], []>} : vector<8x32xf32>, vector<32x128xf32>, vector<8x128xf32> -> vector<8x128xf32>
    %146 = arith.addf %144, %145 : vector<8x128xf32>
    %147 = vector.extract_strided_slice %146 {offsets = [0, 0], sizes = [8, 96], strides = [1, 1]} : vector<8x128xf32> to vector<8x96xf32>
    %148 = arith.negf %147 : vector<8x96xf32>
    %149 = math.exp %148 : vector<8x96xf32>
    %cst_39 = arith.constant 1.000000e+00 : f32
    %150 = vector.broadcast %cst_39 : f32 to vector<8x96xf32>
    %151 = arith.addf %150, %149 : vector<8x96xf32>
    %152 = arith.divf %150, %151 : vector<8x96xf32>
    %153 = vector.extract_strided_slice %152 {offsets = [0, 0], sizes = [8, 32], strides = [1, 1]} : vector<8x96xf32> to vector<8x32xf32>
    %154 = vector.extract_strided_slice %152 {offsets = [0, 32], sizes = [8, 32], strides = [1, 1]} : vector<8x96xf32> to vector<8x32xf32>
    %155 = vector.extract_strided_slice %152 {offsets = [0, 64], sizes = [8, 32], strides = [1, 1]} : vector<8x96xf32> to vector<8x32xf32>
    %156 = vector.extract_strided_slice %146 {offsets = [0, 96], sizes = [8, 32], strides = [1, 1]} : vector<8x128xf32> to vector<8x32xf32>
    %157 = math.tanh %156 : vector<8x32xf32>
    %158 = arith.mulf %154, %117 : vector<8x32xf32>
    %159 = arith.mulf %153, %157 : vector<8x32xf32>
    %160 = arith.addf %158, %159 : vector<8x32xf32>
    %161 = math.tanh %160 : vector<8x32xf32>
    %162 = arith.mulf %155, %161 : vector<8x32xf32>
    %cst_40 = arith.constant dense<0.000000e+00> : vector<8x128xf32>
    %163 = tpu.matmul %162, %8, %cst_40 {dimension_numbers = #tpu.dot_dimension_numbers<[1], [0], [0], [1], [0, 0, 1, 1], [], []>} : vector<8x32xf32>, vector<32x128xf32>, vector<8x128xf32> -> vector<8x128xf32>
    %cst_41 = arith.constant dense<0.000000e+00> : vector<8x128xf32>
    %164 = tpu.matmul %140, %9, %cst_41 {dimension_numbers = #tpu.dot_dimension_numbers<[1], [0], [0], [1], [0, 0, 1, 1], [], []>} : vector<8x32xf32>, vector<32x128xf32>, vector<8x128xf32> -> vector<8x128xf32>
    %165 = arith.addf %163, %164 : vector<8x128xf32>
    %166 = vector.broadcast %10 : vector<1x128xf32> to vector<8x128xf32>
    %167 = arith.addf %165, %166 : vector<8x128xf32>
    %168 = vector.extract_strided_slice %167 {offsets = [0, 0], sizes = [8, 96], strides = [1, 1]} : vector<8x128xf32> to vector<8x96xf32>
    %169 = arith.negf %168 : vector<8x96xf32>
    %170 = math.exp %169 : vector<8x96xf32>
    %cst_42 = arith.constant 1.000000e+00 : f32
    %171 = vector.broadcast %cst_42 : f32 to vector<8x96xf32>
    %172 = arith.addf %171, %170 : vector<8x96xf32>
    %173 = arith.divf %171, %172 : vector<8x96xf32>
    %174 = vector.extract_strided_slice %173 {offsets = [0, 0], sizes = [8, 32], strides = [1, 1]} : vector<8x96xf32> to vector<8x32xf32>
    %175 = vector.extract_strided_slice %173 {offsets = [0, 32], sizes = [8, 32], strides = [1, 1]} : vector<8x96xf32> to vector<8x32xf32>
    %176 = vector.extract_strided_slice %173 {offsets = [0, 64], sizes = [8, 32], strides = [1, 1]} : vector<8x96xf32> to vector<8x32xf32>
    %177 = vector.extract_strided_slice %167 {offsets = [0, 96], sizes = [8, 32], strides = [1, 1]} : vector<8x128xf32> to vector<8x32xf32>
    %178 = math.tanh %177 : vector<8x32xf32>
    %179 = arith.mulf %175, %138 : vector<8x32xf32>
    %180 = arith.mulf %174, %178 : vector<8x32xf32>
    %181 = arith.addf %179, %180 : vector<8x32xf32>
    %182 = math.tanh %181 : vector<8x32xf32>
    %183 = arith.mulf %176, %182 : vector<8x32xf32>
    %c4_i32 = arith.constant 4 : i32
    %c8_i32_43 = arith.constant 8 : i32
    %184 = arith.muli %c4_i32, %c8_i32_43 : i32
    %185 = tpu.assume_multiple %184, 8 : i32
    %186 = arith.index_cast %185 : i32 to index
    %c0_44 = arith.constant 0 : index
    %187 = vector.load %arg10[%186, %c0_44] : memref<64x128xf32, #tpu.memory_space<vmem>>, vector<8x128xf32>
    %cst_45 = arith.constant dense<0.000000e+00> : vector<8x128xf32>
    %188 = tpu.matmul %162, %7, %cst_45 {dimension_numbers = #tpu.dot_dimension_numbers<[1], [0], [0], [1], [0, 0, 1, 1], [], []>} : vector<8x32xf32>, vector<32x128xf32>, vector<8x128xf32> -> vector<8x128xf32>
    %189 = arith.addf %187, %188 : vector<8x128xf32>
    %190 = vector.extract_strided_slice %189 {offsets = [0, 0], sizes = [8, 96], strides = [1, 1]} : vector<8x128xf32> to vector<8x96xf32>
    %191 = arith.negf %190 : vector<8x96xf32>
    %192 = math.exp %191 : vector<8x96xf32>
    %cst_46 = arith.constant 1.000000e+00 : f32
    %193 = vector.broadcast %cst_46 : f32 to vector<8x96xf32>
    %194 = arith.addf %193, %192 : vector<8x96xf32>
    %195 = arith.divf %193, %194 : vector<8x96xf32>
    %196 = vector.extract_strided_slice %195 {offsets = [0, 0], sizes = [8, 32], strides = [1, 1]} : vector<8x96xf32> to vector<8x32xf32>
    %197 = vector.extract_strided_slice %195 {offsets = [0, 32], sizes = [8, 32], strides = [1, 1]} : vector<8x96xf32> to vector<8x32xf32>
    %198 = vector.extract_strided_slice %195 {offsets = [0, 64], sizes = [8, 32], strides = [1, 1]} : vector<8x96xf32> to vector<8x32xf32>
    %199 = vector.extract_strided_slice %189 {offsets = [0, 96], sizes = [8, 32], strides = [1, 1]} : vector<8x128xf32> to vector<8x32xf32>
    %200 = math.tanh %199 : vector<8x32xf32>
    %201 = arith.mulf %197, %160 : vector<8x32xf32>
    %202 = arith.mulf %196, %200 : vector<8x32xf32>
    %203 = arith.addf %201, %202 : vector<8x32xf32>
    %204 = math.tanh %203 : vector<8x32xf32>
    %205 = arith.mulf %198, %204 : vector<8x32xf32>
    %cst_47 = arith.constant dense<0.000000e+00> : vector<8x128xf32>
    %206 = tpu.matmul %205, %8, %cst_47 {dimension_numbers = #tpu.dot_dimension_numbers<[1], [0], [0], [1], [0, 0, 1, 1], [], []>} : vector<8x32xf32>, vector<32x128xf32>, vector<8x128xf32> -> vector<8x128xf32>
    %cst_48 = arith.constant dense<0.000000e+00> : vector<8x128xf32>
    %207 = tpu.matmul %183, %9, %cst_48 {dimension_numbers = #tpu.dot_dimension_numbers<[1], [0], [0], [1], [0, 0, 1, 1], [], []>} : vector<8x32xf32>, vector<32x128xf32>, vector<8x128xf32> -> vector<8x128xf32>
    %208 = arith.addf %206, %207 : vector<8x128xf32>
    %209 = vector.broadcast %10 : vector<1x128xf32> to vector<8x128xf32>
    %210 = arith.addf %208, %209 : vector<8x128xf32>
    %211 = vector.extract_strided_slice %210 {offsets = [0, 0], sizes = [8, 96], strides = [1, 1]} : vector<8x128xf32> to vector<8x96xf32>
    %212 = arith.negf %211 : vector<8x96xf32>
    %213 = math.exp %212 : vector<8x96xf32>
    %cst_49 = arith.constant 1.000000e+00 : f32
    %214 = vector.broadcast %cst_49 : f32 to vector<8x96xf32>
    %215 = arith.addf %214, %213 : vector<8x96xf32>
    %216 = arith.divf %214, %215 : vector<8x96xf32>
    %217 = vector.extract_strided_slice %216 {offsets = [0, 0], sizes = [8, 32], strides = [1, 1]} : vector<8x96xf32> to vector<8x32xf32>
    %218 = vector.extract_strided_slice %216 {offsets = [0, 32], sizes = [8, 32], strides = [1, 1]} : vector<8x96xf32> to vector<8x32xf32>
    %219 = vector.extract_strided_slice %216 {offsets = [0, 64], sizes = [8, 32], strides = [1, 1]} : vector<8x96xf32> to vector<8x32xf32>
    %220 = vector.extract_strided_slice %210 {offsets = [0, 96], sizes = [8, 32], strides = [1, 1]} : vector<8x128xf32> to vector<8x32xf32>
    %221 = math.tanh %220 : vector<8x32xf32>
    %222 = arith.mulf %218, %181 : vector<8x32xf32>
    %223 = arith.mulf %217, %221 : vector<8x32xf32>
    %224 = arith.addf %222, %223 : vector<8x32xf32>
    %225 = math.tanh %224 : vector<8x32xf32>
    %226 = arith.mulf %219, %225 : vector<8x32xf32>
    %c5_i32 = arith.constant 5 : i32
    %c8_i32_50 = arith.constant 8 : i32
    %227 = arith.muli %c5_i32, %c8_i32_50 : i32
    %228 = tpu.assume_multiple %227, 8 : i32
    %229 = arith.index_cast %228 : i32 to index
    %c0_51 = arith.constant 0 : index
    %230 = vector.load %arg10[%229, %c0_51] : memref<64x128xf32, #tpu.memory_space<vmem>>, vector<8x128xf32>
    %cst_52 = arith.constant dense<0.000000e+00> : vector<8x128xf32>
    %231 = tpu.matmul %205, %7, %cst_52 {dimension_numbers = #tpu.dot_dimension_numbers<[1], [0], [0], [1], [0, 0, 1, 1], [], []>} : vector<8x32xf32>, vector<32x128xf32>, vector<8x128xf32> -> vector<8x128xf32>
    %232 = arith.addf %230, %231 : vector<8x128xf32>
    %233 = vector.extract_strided_slice %232 {offsets = [0, 0], sizes = [8, 96], strides = [1, 1]} : vector<8x128xf32> to vector<8x96xf32>
    %234 = arith.negf %233 : vector<8x96xf32>
    %235 = math.exp %234 : vector<8x96xf32>
    %cst_53 = arith.constant 1.000000e+00 : f32
    %236 = vector.broadcast %cst_53 : f32 to vector<8x96xf32>
    %237 = arith.addf %236, %235 : vector<8x96xf32>
    %238 = arith.divf %236, %237 : vector<8x96xf32>
    %239 = vector.extract_strided_slice %238 {offsets = [0, 0], sizes = [8, 32], strides = [1, 1]} : vector<8x96xf32> to vector<8x32xf32>
    %240 = vector.extract_strided_slice %238 {offsets = [0, 32], sizes = [8, 32], strides = [1, 1]} : vector<8x96xf32> to vector<8x32xf32>
    %241 = vector.extract_strided_slice %238 {offsets = [0, 64], sizes = [8, 32], strides = [1, 1]} : vector<8x96xf32> to vector<8x32xf32>
    %242 = vector.extract_strided_slice %232 {offsets = [0, 96], sizes = [8, 32], strides = [1, 1]} : vector<8x128xf32> to vector<8x32xf32>
    %243 = math.tanh %242 : vector<8x32xf32>
    %244 = arith.mulf %240, %203 : vector<8x32xf32>
    %245 = arith.mulf %239, %243 : vector<8x32xf32>
    %246 = arith.addf %244, %245 : vector<8x32xf32>
    %247 = math.tanh %246 : vector<8x32xf32>
    %248 = arith.mulf %241, %247 : vector<8x32xf32>
    %cst_54 = arith.constant dense<0.000000e+00> : vector<8x128xf32>
    %249 = tpu.matmul %248, %8, %cst_54 {dimension_numbers = #tpu.dot_dimension_numbers<[1], [0], [0], [1], [0, 0, 1, 1], [], []>} : vector<8x32xf32>, vector<32x128xf32>, vector<8x128xf32> -> vector<8x128xf32>
    %cst_55 = arith.constant dense<0.000000e+00> : vector<8x128xf32>
    %250 = tpu.matmul %226, %9, %cst_55 {dimension_numbers = #tpu.dot_dimension_numbers<[1], [0], [0], [1], [0, 0, 1, 1], [], []>} : vector<8x32xf32>, vector<32x128xf32>, vector<8x128xf32> -> vector<8x128xf32>
    %251 = arith.addf %249, %250 : vector<8x128xf32>
    %252 = vector.broadcast %10 : vector<1x128xf32> to vector<8x128xf32>
    %253 = arith.addf %251, %252 : vector<8x128xf32>
    %254 = vector.extract_strided_slice %253 {offsets = [0, 0], sizes = [8, 96], strides = [1, 1]} : vector<8x128xf32> to vector<8x96xf32>
    %255 = arith.negf %254 : vector<8x96xf32>
    %256 = math.exp %255 : vector<8x96xf32>
    %cst_56 = arith.constant 1.000000e+00 : f32
    %257 = vector.broadcast %cst_56 : f32 to vector<8x96xf32>
    %258 = arith.addf %257, %256 : vector<8x96xf32>
    %259 = arith.divf %257, %258 : vector<8x96xf32>
    %260 = vector.extract_strided_slice %259 {offsets = [0, 0], sizes = [8, 32], strides = [1, 1]} : vector<8x96xf32> to vector<8x32xf32>
    %261 = vector.extract_strided_slice %259 {offsets = [0, 32], sizes = [8, 32], strides = [1, 1]} : vector<8x96xf32> to vector<8x32xf32>
    %262 = vector.extract_strided_slice %259 {offsets = [0, 64], sizes = [8, 32], strides = [1, 1]} : vector<8x96xf32> to vector<8x32xf32>
    %263 = vector.extract_strided_slice %253 {offsets = [0, 96], sizes = [8, 32], strides = [1, 1]} : vector<8x128xf32> to vector<8x32xf32>
    %264 = math.tanh %263 : vector<8x32xf32>
    %265 = arith.mulf %261, %224 : vector<8x32xf32>
    %266 = arith.mulf %260, %264 : vector<8x32xf32>
    %267 = arith.addf %265, %266 : vector<8x32xf32>
    %268 = math.tanh %267 : vector<8x32xf32>
    %269 = arith.mulf %262, %268 : vector<8x32xf32>
    %c6_i32 = arith.constant 6 : i32
    %c8_i32_57 = arith.constant 8 : i32
    %270 = arith.muli %c6_i32, %c8_i32_57 : i32
    %271 = tpu.assume_multiple %270, 8 : i32
    %272 = arith.index_cast %271 : i32 to index
    %c0_58 = arith.constant 0 : index
    %273 = vector.load %arg10[%272, %c0_58] : memref<64x128xf32, #tpu.memory_space<vmem>>, vector<8x128xf32>
    %cst_59 = arith.constant dense<0.000000e+00> : vector<8x128xf32>
    %274 = tpu.matmul %248, %7, %cst_59 {dimension_numbers = #tpu.dot_dimension_numbers<[1], [0], [0], [1], [0, 0, 1, 1], [], []>} : vector<8x32xf32>, vector<32x128xf32>, vector<8x128xf32> -> vector<8x128xf32>
    %275 = arith.addf %273, %274 : vector<8x128xf32>
    %276 = vector.extract_strided_slice %275 {offsets = [0, 0], sizes = [8, 96], strides = [1, 1]} : vector<8x128xf32> to vector<8x96xf32>
    %277 = arith.negf %276 : vector<8x96xf32>
    %278 = math.exp %277 : vector<8x96xf32>
    %cst_60 = arith.constant 1.000000e+00 : f32
    %279 = vector.broadcast %cst_60 : f32 to vector<8x96xf32>
    %280 = arith.addf %279, %278 : vector<8x96xf32>
    %281 = arith.divf %279, %280 : vector<8x96xf32>
    %282 = vector.extract_strided_slice %281 {offsets = [0, 0], sizes = [8, 32], strides = [1, 1]} : vector<8x96xf32> to vector<8x32xf32>
    %283 = vector.extract_strided_slice %281 {offsets = [0, 32], sizes = [8, 32], strides = [1, 1]} : vector<8x96xf32> to vector<8x32xf32>
    %284 = vector.extract_strided_slice %281 {offsets = [0, 64], sizes = [8, 32], strides = [1, 1]} : vector<8x96xf32> to vector<8x32xf32>
    %285 = vector.extract_strided_slice %275 {offsets = [0, 96], sizes = [8, 32], strides = [1, 1]} : vector<8x128xf32> to vector<8x32xf32>
    %286 = math.tanh %285 : vector<8x32xf32>
    %287 = arith.mulf %283, %246 : vector<8x32xf32>
    %288 = arith.mulf %282, %286 : vector<8x32xf32>
    %289 = arith.addf %287, %288 : vector<8x32xf32>
    %290 = math.tanh %289 : vector<8x32xf32>
    %291 = arith.mulf %284, %290 : vector<8x32xf32>
    %cst_61 = arith.constant dense<0.000000e+00> : vector<8x128xf32>
    %292 = tpu.matmul %291, %8, %cst_61 {dimension_numbers = #tpu.dot_dimension_numbers<[1], [0], [0], [1], [0, 0, 1, 1], [], []>} : vector<8x32xf32>, vector<32x128xf32>, vector<8x128xf32> -> vector<8x128xf32>
    %cst_62 = arith.constant dense<0.000000e+00> : vector<8x128xf32>
    %293 = tpu.matmul %269, %9, %cst_62 {dimension_numbers = #tpu.dot_dimension_numbers<[1], [0], [0], [1], [0, 0, 1, 1], [], []>} : vector<8x32xf32>, vector<32x128xf32>, vector<8x128xf32> -> vector<8x128xf32>
    %294 = arith.addf %292, %293 : vector<8x128xf32>
    %295 = vector.broadcast %10 : vector<1x128xf32> to vector<8x128xf32>
    %296 = arith.addf %294, %295 : vector<8x128xf32>
    %297 = vector.extract_strided_slice %296 {offsets = [0, 0], sizes = [8, 96], strides = [1, 1]} : vector<8x128xf32> to vector<8x96xf32>
    %298 = arith.negf %297 : vector<8x96xf32>
    %299 = math.exp %298 : vector<8x96xf32>
    %cst_63 = arith.constant 1.000000e+00 : f32
    %300 = vector.broadcast %cst_63 : f32 to vector<8x96xf32>
    %301 = arith.addf %300, %299 : vector<8x96xf32>
    %302 = arith.divf %300, %301 : vector<8x96xf32>
    %303 = vector.extract_strided_slice %302 {offsets = [0, 0], sizes = [8, 32], strides = [1, 1]} : vector<8x96xf32> to vector<8x32xf32>
    %304 = vector.extract_strided_slice %302 {offsets = [0, 32], sizes = [8, 32], strides = [1, 1]} : vector<8x96xf32> to vector<8x32xf32>
    %305 = vector.extract_strided_slice %302 {offsets = [0, 64], sizes = [8, 32], strides = [1, 1]} : vector<8x96xf32> to vector<8x32xf32>
    %306 = vector.extract_strided_slice %296 {offsets = [0, 96], sizes = [8, 32], strides = [1, 1]} : vector<8x128xf32> to vector<8x32xf32>
    %307 = math.tanh %306 : vector<8x32xf32>
    %308 = arith.mulf %304, %267 : vector<8x32xf32>
    %309 = arith.mulf %303, %307 : vector<8x32xf32>
    %310 = arith.addf %308, %309 : vector<8x32xf32>
    %311 = math.tanh %310 : vector<8x32xf32>
    %312 = arith.mulf %305, %311 : vector<8x32xf32>
    %c7_i32 = arith.constant 7 : i32
    %c8_i32_64 = arith.constant 8 : i32
    %313 = arith.muli %c7_i32, %c8_i32_64 : i32
    %314 = tpu.assume_multiple %313, 8 : i32
    %315 = arith.index_cast %314 : i32 to index
    %c0_65 = arith.constant 0 : index
    %316 = vector.load %arg10[%315, %c0_65] : memref<64x128xf32, #tpu.memory_space<vmem>>, vector<8x128xf32>
    %cst_66 = arith.constant dense<0.000000e+00> : vector<8x128xf32>
    %317 = tpu.matmul %291, %7, %cst_66 {dimension_numbers = #tpu.dot_dimension_numbers<[1], [0], [0], [1], [0, 0, 1, 1], [], []>} : vector<8x32xf32>, vector<32x128xf32>, vector<8x128xf32> -> vector<8x128xf32>
    %318 = arith.addf %316, %317 : vector<8x128xf32>
    %319 = vector.extract_strided_slice %318 {offsets = [0, 0], sizes = [8, 96], strides = [1, 1]} : vector<8x128xf32> to vector<8x96xf32>
    %320 = arith.negf %319 : vector<8x96xf32>
    %321 = math.exp %320 : vector<8x96xf32>
    %cst_67 = arith.constant 1.000000e+00 : f32
    %322 = vector.broadcast %cst_67 : f32 to vector<8x96xf32>
    %323 = arith.addf %322, %321 : vector<8x96xf32>
    %324 = arith.divf %322, %323 : vector<8x96xf32>
    %325 = vector.extract_strided_slice %324 {offsets = [0, 0], sizes = [8, 32], strides = [1, 1]} : vector<8x96xf32> to vector<8x32xf32>
    %326 = vector.extract_strided_slice %324 {offsets = [0, 32], sizes = [8, 32], strides = [1, 1]} : vector<8x96xf32> to vector<8x32xf32>
    %327 = vector.extract_strided_slice %324 {offsets = [0, 64], sizes = [8, 32], strides = [1, 1]} : vector<8x96xf32> to vector<8x32xf32>
    %328 = vector.extract_strided_slice %318 {offsets = [0, 96], sizes = [8, 32], strides = [1, 1]} : vector<8x128xf32> to vector<8x32xf32>
    %329 = math.tanh %328 : vector<8x32xf32>
    %330 = arith.mulf %326, %289 : vector<8x32xf32>
    %331 = arith.mulf %325, %329 : vector<8x32xf32>
    %332 = arith.addf %330, %331 : vector<8x32xf32>
    %333 = math.tanh %332 : vector<8x32xf32>
    %334 = arith.mulf %327, %333 : vector<8x32xf32>
    %cst_68 = arith.constant dense<0.000000e+00> : vector<8x128xf32>
    %335 = tpu.matmul %334, %8, %cst_68 {dimension_numbers = #tpu.dot_dimension_numbers<[1], [0], [0], [1], [0, 0, 1, 1], [], []>} : vector<8x32xf32>, vector<32x128xf32>, vector<8x128xf32> -> vector<8x128xf32>
    %cst_69 = arith.constant dense<0.000000e+00> : vector<8x128xf32>
    %336 = tpu.matmul %312, %9, %cst_69 {dimension_numbers = #tpu.dot_dimension_numbers<[1], [0], [0], [1], [0, 0, 1, 1], [], []>} : vector<8x32xf32>, vector<32x128xf32>, vector<8x128xf32> -> vector<8x128xf32>
    %337 = arith.addf %335, %336 : vector<8x128xf32>
    %338 = vector.broadcast %10 : vector<1x128xf32> to vector<8x128xf32>
    %339 = arith.addf %337, %338 : vector<8x128xf32>
    %340 = vector.extract_strided_slice %339 {offsets = [0, 0], sizes = [8, 96], strides = [1, 1]} : vector<8x128xf32> to vector<8x96xf32>
    %341 = arith.negf %340 : vector<8x96xf32>
    %342 = math.exp %341 : vector<8x96xf32>
    %cst_70 = arith.constant 1.000000e+00 : f32
    %343 = vector.broadcast %cst_70 : f32 to vector<8x96xf32>
    %344 = arith.addf %343, %342 : vector<8x96xf32>
    %345 = arith.divf %343, %344 : vector<8x96xf32>
    %346 = vector.extract_strided_slice %345 {offsets = [0, 0], sizes = [8, 32], strides = [1, 1]} : vector<8x96xf32> to vector<8x32xf32>
    %347 = vector.extract_strided_slice %345 {offsets = [0, 32], sizes = [8, 32], strides = [1, 1]} : vector<8x96xf32> to vector<8x32xf32>
    %348 = vector.extract_strided_slice %345 {offsets = [0, 64], sizes = [8, 32], strides = [1, 1]} : vector<8x96xf32> to vector<8x32xf32>
    %349 = vector.extract_strided_slice %339 {offsets = [0, 96], sizes = [8, 32], strides = [1, 1]} : vector<8x128xf32> to vector<8x32xf32>
    %350 = math.tanh %349 : vector<8x32xf32>
    %351 = arith.mulf %347, %310 : vector<8x32xf32>
    %352 = arith.mulf %346, %350 : vector<8x32xf32>
    %353 = arith.addf %351, %352 : vector<8x32xf32>
    %354 = math.tanh %353 : vector<8x32xf32>
    %355 = arith.mulf %348, %354 : vector<8x32xf32>
    %c8_i32_71 = arith.constant 8 : i32
    %c0_72 = arith.constant 0 : index
    %c0_73 = arith.constant 0 : index
    %356 = vector.load %arg7[%c0_72, %c0_73] : memref<1x32xf32, #tpu.memory_space<vmem>>, vector<1x32xf32>
    %357 = vector.broadcast %356 : vector<1x32xf32> to vector<8x32xf32>
    %358 = arith.mulf %355, %357 : vector<8x32xf32>
    %cst_74 = arith.constant dense<0.000000e+00> : vector<8xf32>
    %359 = vector.multi_reduction <add>, %358, %cst_74 [1] : vector<8x32xf32> to vector<8xf32>
    %360 = vector.shape_cast %359 : vector<8xf32> to vector<8x1xf32>
    %c0_75 = arith.constant 0 : index
    %c0_76 = arith.constant 0 : index
    %361 = vector.load %arg8[%c0_75, %c0_76] : memref<1x1xf32, #tpu.memory_space<vmem>>, vector<1x1xf32>
    %362 = vector.broadcast %361 : vector<1x1xf32> to vector<8x1xf32>
    %363 = arith.addf %360, %362 : vector<8x1xf32>
    %c0_77 = arith.constant 0 : index
    %c0_78 = arith.constant 0 : index
    %364 = vector.load %arg9[%c0_77, %c0_78] : memref<8x1xf32, #tpu.memory_space<vmem>>, vector<8x1xf32>
    tpu.vector_store %arg9[%c0_77, %c0_78], %363 {strides = array<i32>} : memref<8x1xf32, #tpu.memory_space<vmem>>, vector<8x1xf32>,
    return
  }
}

</mosaic_0001>

<bundles_post_ra>
// kernel: tpu_custom_call.1
= control target key start
LH: loop header
LB: loop body
LE: loop exit
PB: predicated region body
PF: predicated region fallthrough
CT: control target
= control target key end

     0   :  { %s3679_s0 = inlined_call_operand.vmem [shape: f32[64,4], index: 0, kind: input, shape index: {}]   ;;  %s3680_s1 = inlined_call_operand.vmem [shape: f32[4,128], index: 1, kind: input, shape index: {}]   ;;  %s3681_s2 = inlined_call_operand.vmem [shape: f32[32,128], index: 2, kind: input, shape index: {}]   ;;  %s3682_s3 = inlined_call_operand.vmem [shape: f32[1,128], index: 3, kind: input, shape index: {}]   ;;  %s3683_s4 = inlined_call_operand.vmem [shape: f32[32,128], index: 4, kind: input, shape index: {}]   ;;  %s3684_s5 = inlined_call_operand.hbm [shape: f32[32,128], index: 5, kind: input, shape index: {}]   ;;  %s3685_s6 = inlined_call_operand.vmem [shape: f32[1,128], index: 6, kind: input, shape index: {}]   ;;  %s3686_s7 = inlined_call_operand.vmem [shape: f32[1,32], index: 7, kind: input, shape index: {}]   ;;  %s3687_s8 = inlined_call_operand.<no memory space> [shape: f32[1,1], index: 8, kind: input, shape index: {}]   ;;  %s3688_s9 = inlined_call_operand.vmem [shape: f32[8,1], index: 9, kind: output, shape index: {}]  }
   0x1   :  { %v14_v0 = vstv %s3687_s8 }
   0x2   :  { %15 = vst [vmem:[#allocation3] sm:$0x1] %v14_v0 }
   0x3   :  { %16 = vsyncpa [#allocation5], 0  ;;  %s3194_s11 = smov [#allocation4]   ;;  %s3170_s15 = scalar_lea.hbm %s3684_s5, 512 }
   0x4   :  { %s32_s12 = sshll.u32 %s3194_s11, 4  ;;  %p3171_p0 = scmp.ne.s32.totalorder %s3684_s5, %s3170_s15  ;;  %s33_s12 = int_to_ptr.vmem [resolvable:$true] %s32_s12 }
   0x5   :  { %p3174_p1 = scmp.lt.u32.totalorder %s3170_s15, %s3684_s5 }
   0x7   :  { %p3176_p2 = pnand %p3174_p1, %p3171_p0 }
   0x9   :  { %3179 = shalt.err (!%p3176_p2)
}
   0xa   :  { %s3180_s8 = scalar_lea.vmem %s33_s12, 512  ;;  %p3185_p4 = scmp.lt.s32.totalorder %s33_s12, %s33_s12 }
   0xb   :  { %p3181_p3 = scmp.ne.s32.totalorder %s33_s12, %s3180_s8  ;;  %p3186_p5 = scmp.lt.s32.totalorder %s3180_s8, %s3180_s8 }
   0xd   :  { %p3187_p6 = por %p3186_p5, %p3185_p4 }
   0xf   :  { %p3188_p7 = pnand %p3187_p6, %p3181_p3 }
  0x11   :  { %3191 = shalt.err (!%p3188_p7)
}
  0x12   :  { %s3195_s20 = smov 128   ;;  %s3196_s21 = smov 8  }
  0x13   :  { %38 = dma.hbm_to_vmem [thread:$0]  %s3684_s5, 512, %s33_s12, [#allocation5], %s3195_s20, %s3195_s20, %s3196_s21  }
  0x14   :  { %3192 = dma.done.wait [#allocation5], 512  }
  0x15   :  { %3193 = vsyncadd [#allocation5], 4294966784  ;;  %v3197_v1 = vmov 0.0|0.0   ;;  %vm3198_vm0 = vmmov 0   ;;  %v3199_v2 = vmov 0.0   ;;  %vm89_vm1 = vcmask 1043456  }
  0x16   :  { %2889 = vmatprep.subr.bf16.mxu1 %v3197_v1  ;;  %2633 = vmatprep.mubr.msk.f32.mxu1 %vm3198_vm0, %v3199_v2  ;;  %vm64_vm2 = vcmask 31744   ;;  %v206_v3 = vld [vmem:[%s3681_s2] sm:$0xff]  ;;  %v207_v4 = vld [vmem:[%s3681_s2 + $0x8] sm:$0xff]  ;;  %v208_v9 = vld [vmem:[%s3681_s2 + $0x10] sm:$0xff]  ;;  %s3200_s16 = smov 32   ;;  %vm220_vm3 = vcmask 261120  }
  0x17   :  { %v56_v5 = vld [vmem:[%s3680_s1] sm:$0xf]  ;;  %v3279_v6 = vpack.c.bf16 %v207_v4, %v206_v3  ;;  %v49_v8 = vld [vmem:[%s3679_s0 + $0x8] sm:$0xff]  ;;  %v209_v10 = vld [vmem:[%s3681_s2 + $0x18] sm:$0xff]  ;;  %vm2424_vm4 = vcmask 7168  }
  0x18   :  { %2611 = vmatprep.subr.msk.mxu0 %vm89_vm1, %v56_v5  ;;  %v48_v7 = vld [vmem:[%s3679_s0] sm:$0xff]  ;;  %v3296_v11 = vpack.c.bf16 %v209_v10, %v208_v9  ;;  %v211_v30 = vld [vmem:[%s3683_s4 + $0x8] sm:$0xff]  ;;  %v50_v34 = vld [vmem:[%s3679_s0 + $0x10] sm:$0xff] }
  0x19   :  { %2612 = vmatpush3.msk.msra.mxu0 %vm89_vm1, %v56_v5  ;;  %2613 = vmatprep.mubr.msk.f32.mxu0 %vm64_vm2, %v48_v7  ;;  %v3310_v13 = vld [vmem:[%s3682_s3] ss:$0 sm:$0xff]  ;;  %v214_v31 = vld [vmem:[#allocation4] sm:$0xff]  ;;  %v215_v33 = vld [vmem:[#allocation4 + $0x8] sm:$0xff] }
  0x1a   :  { %2891 = vmatpush3.bf16.msra.mxu1 %v3279_v6  ;;  %2614 = vmatmul.mubr.msk.f32.vlgmr.msra.gmra.mrb[0].mxu0 %vm64_vm2, %v49_v8  ;;  %v210_v29 = vld [vmem:[%s3683_s4] sm:$0xff]  ;;  %v51_v35 = vld [vmem:[%s3679_s0 + $0x18] sm:$0xff]  ;;  %v3332_v36 = vpack.c.bf16 %v215_v33, %v214_v31  ;;  %v212_v40 = vld [vmem:[%s3683_s4 + $0x10] sm:$0xff] }
  0x1b   :  { %2892 = vmatprep.subr.bf16.mxu1 %v3197_v1  ;;  %2901 = vmatprep.subr.bf16.mxu0 %v3197_v1  ;;  %v3324_v32 = vpack.c.bf16 %v211_v30, %v210_v29  ;;  %v216_v37 = vld [vmem:[#allocation4 + $0x10] sm:$0xff]  ;;  %v217_v38 = vld [vmem:[#allocation4 + $0x18] sm:$0xff]  ;;  %v53_v44 = vld [vmem:[%s3679_s0 + $0x28] sm:$0xff] }
  0x1c   :  { %2616 = vmatprep.mubr.msk.f32.mxu0 %vm64_vm2, %v50_v34  ;;  %v52_v39 = vld [vmem:[%s3679_s0 + $0x20] sm:$0xff]  ;;  %v213_v41 = vld [vmem:[%s3683_s4 + $0x18] sm:$0xff]  ;;  %v3347_v42 = vpack.c.bf16 %v217_v38, %v216_v37  ;;  %v54_v45 = vld [vmem:[%s3679_s0 + $0x30] sm:$0xff] }
  0x1d   :  { %2903 = vmatpush3.bf16.msra.mxu0 %v3324_v32  ;;  %v3349_v43 = vpack.c.bf16 %v213_v41, %v212_v40  ;;  %v55_v46 = vld [vmem:[%s3679_s0 + $0x38] sm:$0xff]  ;;  %s3201_s0 = smov 64   ;;  %v3412_v60 = vld [vmem:[%s3685_s6] ss:$0 sm:$0xff] }
  0x1e   :  { %2894 = vmatpush3.bf16.msra.mxu1 %v3296_v11  ;;  %2617 = vmatmul.mubr.msk.f32.gmra.mrb[2].mxu0 %vm64_vm2, %v51_v35 }
  0x1f   :  { %2895 = vmatprep.subr.bf16.mxu1 %v3197_v1  ;;  %2619 = vmatprep.mubr.msk.f32.mxu0 %vm64_vm2, %v52_v39 }
  0x20   :  { %2904 = vmatprep.subr.bf16.mxu0 %v3197_v1 }
  0x21   :  { %2634 = vmatmul.mubr.f32.vlgmr.msra.gmra.mrb[0].mxu1 %v3199_v2  ;;  %2906 = vmatpush3.bf16.msra.mxu0 %v3349_v43 }
  0x22   :  { %2644 = vmatprep.mubr.msk.f32.mxu1 %vm3198_vm0, %v3199_v2  ;;  %2897 = vmatpush3.bf16.msra.mxu1 %v3332_v36 }
  0x23   :  { %2898 = vmatprep.subr.bf16.mxu1 %v3197_v1  ;;  %2620 = vmatmul.mubr.msk.f32.gmra.mrb[4].mxu0 %vm64_vm2, %v53_v44 }
  0x24   :  { %2622 = vmatprep.mubr.msk.f32.mxu0 %vm64_vm2, %v54_v45  ;;  %2913 = vmatprep.subr.bf16.mxu0 %v3197_v1 }
  0x26   :  { %2900 = vmatpush3.bf16.msra.mxu1 %v3347_v42 }
  0x27   :  { %2907 = vmatprep.subr.bf16.mxu1 %v3197_v1  ;;  %2623 = vmatmul.mubr.msk.f32.gmra.mrb[6].mxu0 %vm64_vm2, %v55_v46 }
  0x28   :  { %2655 = vmatprep.mubr.msk.f32.mxu0 %vm3198_vm0, %v3199_v2 }
  0x29   :  { %2645 = vmatmul.mubr.f32.vlgmr.msra.gmra.mrb[2].mxu1 %v3199_v2 }
  0x2a   :  { %2909 = vmatpush3.bf16.msra.mxu1 %v3279_v6  ;;  %2666 = vmatprep.mubr.msk.f32.mxu1 %vm3198_vm0, %v3199_v2 }
  0x2b   :  { %2910 = vmatprep.subr.bf16.mxu1 %v3197_v1 }
  0x2e   :  { %2912 = vmatpush3.bf16.msra.mxu1 %v3296_v11 }
  0x2f   :  { %2919 = vmatprep.subr.bf16.mxu1 %v3197_v1 }
  0xed   :  { %v3305_v12 = vpop.f32.mrb[0].mxu0 }
  0xee   :  { %v159_v14 = vpop.f32.mrb[1].mxu0  ;;  %v165_v59 = vadd.f32 %v3305_v12, %v3310_v13 }
  0xef   :  { %v160_v15 = vadd.f32 %v3310_v13, %v159_v14 }
  0xf1   :  { %v3381_v50 = vpop.f32.mrb[2].mxu0 }
  0xf2   :  { %v3383_v51 = vpop.f32.mrb[3].mxu0 }
  0xf4   :  { %v290_v16 = vpop.f32.mrb[0].mxu1 }
  0xf5   :  { %v294_v17 = vadd.f32 %v290_v16, %v160_v15  ;;  %v2635_v18 = vpop.f32.mrb[1].mxu1 }
  0xf6   :  { %v3385_v52 = vpop.f32.mrb[4].mxu0 }
  0xf7   :  { %3041 = vtanh.f32 %v294_v17  ;;  %v2441_v20 = vmul.f32 -1.442695, %v294_v17  ;;  %v3387_v53 = vpop.f32.mrb[5].mxu0 }
  0xf9   :  { %3043 = vpow2.f32 %v2441_v20 }
  0xfa   :  { %v3389_v55 = vpop.f32.mrb[6].mxu0 }
  0xfb   :  { %v3391_v57 = vpop.f32.mrb[7].mxu0 }
  0xfc   :  { %v385_v54 = vpop.f32.mrb[2].mxu1 }
  0xfd   :  { %v2646_v56 = vpop.f32.mrb[3].mxu1 }
 0x101   :  { %v3042_v19 = vpop.eup %3041 }
 0x102   :  { %304 = vrot.lane.b32.xlu0 %v3042_v19, %s3200_s16 }
 0x103   :  { %v3044_v21 = vpop.eup %3043 }
 0x104   :  { %v298_v22 = vadd.f32 1.0, %v3044_v21 }
 0x106   :  { %3045 = vrcp.f32 %v298_v22 }
 0x110   :  { %v3046_v23 = vpop.eup %3045 }
 0x111   :  { %v302_v26 = vmul.f32 0.0, %v3046_v23 }
 0x174   :  { %v305_v24 = vpop.permute.xlu0 %304 }
 0x175   :  { %v307_v25 = vmul.f32 %v3046_v23, %v305_v24 }
 0x177   :  { %309 = vrot.lane.b32.xlu0 %v307_v25, %s3200_s16 }
 0x1e9   :  { %v310_v27 = vpop.permute.xlu0 %309 }
 0x1ea   :  { %v3315_v28 = vadd.f32 %v310_v27, %v302_v26 }
 0x1ec   :  { %3047 = vtanh.f32 %v3315_v28 }
 0x1f6   :  { %v3048_v47 = vpop.eup %3047 }
 0x1f7   :  { %315 = vrot.lane.b32.xlu1 %v3048_v47, %s3200_s16  ;;  %v170_v47 = vadd.f32 %v3310_v13, %v3383_v51 }
 0x269   :  { %v316_v48 = vpop.permute.xlu1 %315 }
 0x26a   :  { %v318_v49 = vmul.f32 %v3046_v23, %v316_v48 }
 0x26c   :  { %390 = vrot.lane.b32.xlu1 %v318_v49, %s3201_s0 }
 0x2de   :  { %v391_v58 = vpop.permute.xlu1 %390 }
 0x2df   :  { %2656 = vmatmul.mubr.msk.f32.vlgmr.msra.gmra.mrb[8].mxu0 %vm220_vm3, %v391_v58  ;;  %2667 = vmatmul.mubr.msk.f32.vlgmr.msra.gmra.mrb[4].mxu1 %vm220_vm3, %v391_v58 }
 0x2e0   :  { %2921 = vmatpush3.bf16.msra.mxu1 %v3324_v32  ;;  %2915 = vmatpush3.bf16.msra.mxu0 %v3332_v36 }
 0x2e1   :  { %2922 = vmatprep.subr.bf16.mxu1 %v3197_v1  ;;  %2916 = vmatprep.subr.bf16.mxu0 %v3197_v1 }
 0x2e2   :  { %2688 = vmatprep.mubr.msk.f32.mxu1 %vm3198_vm0, %v3199_v2  ;;  %2677 = vmatprep.mubr.msk.f32.mxu0 %vm3198_vm0, %v3199_v2 }
 0x2e4   :  { %2924 = vmatpush3.bf16.msra.mxu1 %v3349_v43  ;;  %2918 = vmatpush3.bf16.msra.mxu0 %v3347_v42 }
 0x2e5   :  { %2925 = vmatprep.subr.bf16.mxu0 %v3197_v1  ;;  %2931 = vmatprep.subr.bf16.mxu1 %v3197_v1 }
 0x3b2   :  { %v460_v61 = vpop.f32.mrb[8].mxu0  ;;  %v563_v62 = vpop.f32.mrb[4].mxu1 }
 0x3b3   :  { %v461_v63 = vadd.f32 %v460_v61, %v385_v54  ;;  %v567_v0 = vadd.f32 %v563_v62, %v165_v59  ;;  %v2657_v3 = vpop.f32.mrb[9].mxu0  ;;  %v2668_v4 = vpop.f32.mrb[5].mxu1 }
 0x3b5   :  { %v470_v5 = vadd.f32 %v3412_v60, %v461_v63  ;;  %3049 = vtanh.f32 %v567_v0  ;;  %v2446_v9 = vmul.f32 -1.442695, %v567_v0 }
 0x3b7   :  { %3051 = vtanh.f32 %v470_v5  ;;  %v2444_v10 = vmul.f32 -1.442695, %v470_v5 }
 0x3b8   :  { %3053 = vpow2.f32 %v2446_v9 }
 0x3b9   :  { %3055 = vpow2.f32 %v2444_v10 }
 0x3bf   :  { %v3050_v7 = vpop.eup %3049 }
 0x3c0   :  { %577 = vrot.lane.b32.xlu1 %v3050_v7, %s3200_s16 }
 0x3c1   :  { %v3052_v8 = vpop.eup %3051 }
 0x3c2   :  { %480 = vrot.lane.b32.xlu0 %v3052_v8, %s3200_s16  ;;  %v3054_v12 = vpop.eup %3053 }
 0x3c3   :  { %v3056_v14 = vpop.eup %3055  ;;  %v571_v15 = vadd.f32 1.0, %v3054_v12 }
 0x3c4   :  { %v474_v16 = vadd.f32 1.0, %v3056_v14 }
 0x3c5   :  { %3057 = vrcp.f32 %v571_v15 }
 0x3c6   :  { %3059 = vrcp.f32 %v474_v16 }
 0x3cf   :  { %v3058_v17 = vpop.eup %3057 }
 0x3d0   :  { %v3060_v20 = vpop.eup %3059  ;;  %v575_v23 = vmul.f32 %v3058_v17, %v3315_v28 }
 0x3d1   :  { %v478_v26 = vmul.f32 0.0, %v3060_v20 }
 0x432   :  { %v578_v18 = vpop.permute.xlu1 %577 }
 0x433   :  { %v580_v19 = vmul.f32 %v3058_v17, %v578_v18 }
 0x434   :  { %v481_v21 = vpop.permute.xlu0 %480 }
 0x435   :  { %v483_v22 = vmul.f32 %v3060_v20, %v481_v21  ;;  %582 = vrot.lane.b32.xlu1 %v580_v19, %s3200_s16 }
 0x437   :  { %485 = vrot.lane.b32.xlu0 %v483_v22, %s3200_s16 }
 0x4a7   :  { %v583_v24 = vpop.permute.xlu1 %582 }
 0x4a8   :  { %v3420_v25 = vadd.f32 %v583_v24, %v575_v23 }
 0x4a9   :  { %v486_v27 = vpop.permute.xlu0 %485 }
 0x4aa   :  { %3061 = vtanh.f32 %v3420_v25  ;;  %v3423_v29 = vadd.f32 %v486_v27, %v478_v26 }
 0x4ac   :  { %3063 = vtanh.f32 %v3423_v29 }
 0x4b4   :  { %v3062_v30 = vpop.eup %3061 }
 0x4b5   :  { %588 = vrot.lane.b32.xlu1 %v3062_v30, %s3200_s16  ;;  %v175_v30 = vadd.f32 %v3381_v50, %v3310_v13 }
 0x4b6   :  { %v3064_v31 = vpop.eup %3063 }
 0x4b7   :  { %491 = vrot.lane.b32.xlu0 %v3064_v31, %s3200_s16 }
 0x527   :  { %v589_v33 = vpop.permute.xlu1 %588 }
 0x528   :  { %v591_v34 = vmul.f32 %v3058_v17, %v589_v33 }
 0x529   :  { %v492_v28 = vpop.permute.xlu0 %491 }
 0x52a   :  { %v494_v35 = vmul.f32 %v3060_v20, %v492_v28  ;;  %668 = vrot.lane.b32.xlu1 %v591_v34, %s3201_s0 }
 0x52c   :  { %593 = vrot.lane.b32.xlu0 %v494_v35, %s3201_s0 }
 0x59c   :  { %v669_v37 = vpop.permute.xlu1 %668 }
 0x59d   :  { %2689 = vmatmul.mubr.msk.f32.vlgmr.msra.gmra.mrb[6].mxu1 %vm220_vm3, %v669_v37 }
 0x59e   :  { %v594_v38 = vpop.permute.xlu0 %593  ;;  %2933 = vmatpush3.bf16.msra.mxu1 %v3332_v36  ;;  %2710 = vmatprep.mubr.msk.f32.mxu1 %vm3198_vm0, %v3199_v2 }
 0x59f   :  { %2678 = vmatmul.mubr.msk.f32.vlgmr.msra.gmra.mrb[10].mxu0 %vm220_vm3, %v594_v38  ;;  %2934 = vmatprep.subr.bf16.mxu1 %v3197_v1 }
 0x5a0   :  { %2927 = vmatpush3.bf16.msra.mxu0 %v3279_v6  ;;  %2699 = vmatprep.mubr.msk.f32.mxu0 %vm3198_vm0, %v3199_v2 }
 0x5a1   :  { %2928 = vmatprep.subr.bf16.mxu0 %v3197_v1 }
 0x5a2   :  { %2936 = vmatpush3.bf16.msra.mxu1 %v3347_v42 }
 0x5a3   :  { %2943 = vmatprep.subr.bf16.mxu1 %v3197_v1 }
 0x5a4   :  { %2930 = vmatpush3.bf16.msra.mxu0 %v3296_v11 }
 0x5a5   :  { %2937 = vmatprep.subr.bf16.mxu0 %v3197_v1 }
 0x5a7   :  { %2700 = vmatmul.mubr.msk.f32.vlgmr.msra.gmra.mrb[12].mxu0 %vm220_vm3, %v669_v37 }
 0x5a8   :  { %2939 = vmatpush3.bf16.msra.mxu0 %v3324_v32  ;;  %2721 = vmatprep.mubr.msk.f32.mxu0 %vm3198_vm0, %v3199_v2 }
 0x5a9   :  { %2940 = vmatprep.subr.bf16.mxu0 %v3197_v1 }
 0x5ac   :  { %2942 = vmatpush3.bf16.msra.mxu0 %v3349_v43 }
 0x5ad   :  { %2949 = vmatprep.subr.bf16.mxu0 %v3197_v1 }
 0x670   :  { %v738_v39 = vpop.f32.mrb[6].mxu1 }
 0x671   :  { %v2690_v40 = vpop.f32.mrb[7].mxu1 }
 0x672   :  { %v663_v41 = vpop.f32.mrb[10].mxu0 }
 0x673   :  { %v739_v44 = vadd.f32 %v738_v39, %v663_v41  ;;  %v2679_v45 = vpop.f32.mrb[11].mxu0 }
 0x675   :  { %v742_v46 = vadd.f32 %v3412_v60, %v739_v44 }
 0x677   :  { %3065 = vtanh.f32 %v742_v46  ;;  %v2449_v59 = vmul.f32 -1.442695, %v742_v46 }
 0x67a   :  { %v835_v48 = vpop.f32.mrb[12].mxu0 }
 0x67b   :  { %v839_v49 = vadd.f32 %v835_v48, %v170_v47  ;;  %v2701_v54 = vpop.f32.mrb[13].mxu0 }
 0x67d   :  { %3067 = vtanh.f32 %v839_v49  ;;  %v2451_v61 = vmul.f32 -1.442695, %v839_v49 }
 0x67e   :  { %3069 = vpow2.f32 %v2449_v59 }
 0x67f   :  { %3071 = vpow2.f32 %v2451_v61 }
 0x681   :  { %v3066_v56 = vpop.eup %3065 }
 0x682   :  { %752 = vrot.lane.b32.xlu0 %v3066_v56, %s3200_s16 }
 0x687   :  { %v3068_v58 = vpop.eup %3067 }
 0x688   :  { %849 = vrot.lane.b32.xlu1 %v3068_v58, %s3200_s16  ;;  %v3070_v62 = vpop.eup %3069 }
 0x689   :  { %v746_v63 = vadd.f32 1.0, %v3070_v62  ;;  %v3072_v0 = vpop.eup %3071 }
 0x68a   :  { %v843_v3 = vadd.f32 1.0, %v3072_v0 }
 0x68b   :  { %3073 = vrcp.f32 %v746_v63 }
 0x68c   :  { %3075 = vrcp.f32 %v843_v3 }
 0x695   :  { %v3074_v51 = vpop.eup %3073 }
 0x696   :  { %v3076_v7 = vpop.eup %3075  ;;  %v750_v10 = vmul.f32 %v3074_v51, %v3423_v29 }
 0x697   :  { %v847_v15 = vmul.f32 %v3076_v7, %v3420_v25 }
 0x6f4   :  { %v753_v4 = vpop.permute.xlu0 %752 }
 0x6f5   :  { %v755_v5 = vmul.f32 %v3074_v51, %v753_v4 }
 0x6f7   :  { %757 = vrot.lane.b32.xlu0 %v755_v5, %s3200_s16 }
 0x6fa   :  { %v850_v8 = vpop.permute.xlu1 %849 }
 0x6fb   :  { %v852_v9 = vmul.f32 %v3076_v7, %v850_v8 }
 0x6fd   :  { %854 = vrot.lane.b32.xlu1 %v852_v9, %s3200_s16 }
 0x769   :  { %v758_v12 = vpop.permute.xlu0 %757 }
 0x76a   :  { %v3459_v14 = vadd.f32 %v758_v12, %v750_v10 }
 0x76c   :  { %3077 = vtanh.f32 %v3459_v14 }
 0x76f   :  { %v855_v16 = vpop.permute.xlu1 %854 }
 0x770   :  { %v3463_v17 = vadd.f32 %v855_v16, %v847_v15 }
 0x772   :  { %3079 = vtanh.f32 %v3463_v17 }
 0x776   :  { %v3078_v18 = vpop.eup %3077 }
 0x777   :  { %763 = vrot.lane.b32.xlu0 %v3078_v18, %s3200_s16 }
 0x77c   :  { %v3080_v19 = vpop.eup %3079 }
 0x77d   :  { %860 = vrot.lane.b32.xlu1 %v3080_v19, %s3200_s16 }
 0x7e9   :  { %v764_v20 = vpop.permute.xlu0 %763 }
 0x7ea   :  { %v766_v21 = vmul.f32 %v3074_v51, %v764_v20  ;;  %v180_v20 = vadd.f32 %v3310_v13, %v3387_v53 }
 0x7ec   :  { %865 = vrot.lane.b32.xlu0 %v766_v21, %s3201_s0 }
 0x7ef   :  { %v861_v22 = vpop.permute.xlu1 %860 }
 0x7f0   :  { %v863_v23 = vmul.f32 %v3076_v7, %v861_v22 }
 0x7f2   :  { %940 = vrot.lane.b32.xlu1 %v863_v23, %s3201_s0 }
 0x85e   :  { %v866_v24 = vpop.permute.xlu0 %865 }
 0x85f   :  { %2711 = vmatmul.mubr.msk.f32.vlgmr.msra.gmra.mrb[8].mxu1 %vm220_vm3, %v866_v24 }
 0x860   :  { %2945 = vmatpush3.bf16.msra.mxu1 %v3279_v6  ;;  %2732 = vmatprep.mubr.msk.f32.mxu1 %vm3198_vm0, %v3199_v2 }
 0x861   :  { %2946 = vmatprep.subr.bf16.mxu1 %v3197_v1 }
 0x864   :  { %2948 = vmatpush3.bf16.msra.mxu1 %v3296_v11  ;;  %v941_v25 = vpop.permute.xlu1 %940 }
 0x865   :  { %2722 = vmatmul.mubr.msk.f32.vlgmr.msra.gmra.mrb[14].mxu0 %vm220_vm3, %v941_v25  ;;  %2955 = vmatprep.subr.bf16.mxu1 %v3197_v1 }
 0x866   :  { %2951 = vmatpush3.bf16.msra.mxu0 %v3332_v36  ;;  %2743 = vmatprep.mubr.msk.f32.mxu0 %vm3198_vm0, %v3199_v2 }
 0x867   :  { %2733 = vmatmul.mubr.msk.f32.vlgmr.msra.gmra.mrb[10].mxu1 %vm220_vm3, %v941_v25  ;;  %2952 = vmatprep.subr.bf16.mxu0 %v3197_v1 }
 0x868   :  { %2957 = vmatpush3.bf16.msra.mxu1 %v3324_v32  ;;  %2754 = vmatprep.mubr.msk.f32.mxu1 %vm3198_vm0, %v3199_v2 }
 0x869   :  { %2958 = vmatprep.subr.bf16.mxu1 %v3197_v1 }
 0x86a   :  { %2954 = vmatpush3.bf16.msra.mxu0 %v3347_v42 }
 0x86b   :  { %2961 = vmatprep.subr.bf16.mxu0 %v3197_v1 }
 0x86c   :  { %2960 = vmatpush3.bf16.msra.mxu1 %v3349_v43 }
 0x86d   :  { %2967 = vmatprep.subr.bf16.mxu1 %v3197_v1 }
 0x932   :  { %v935_v26 = vpop.f32.mrb[8].mxu1 }
 0x933   :  { %v2712_v27 = vpop.f32.mrb[9].mxu1 }
 0x938   :  { %v1010_v29 = vpop.f32.mrb[14].mxu0 }
 0x939   :  { %v1011_v31 = vadd.f32 %v1010_v29, %v935_v26  ;;  %v2723_v33 = vpop.f32.mrb[15].mxu0 }
 0x93a   :  { %v1107_v34 = vpop.f32.mrb[10].mxu1 }
 0x93b   :  { %v1014_v28 = vadd.f32 %v3412_v60, %v1011_v31  ;;  %v1111_v35 = vadd.f32 %v1107_v34, %v175_v30  ;;  %v2734_v37 = vpop.f32.mrb[11].mxu1 }
 0x93d   :  { %3081 = vtanh.f32 %v1014_v28  ;;  %v2454_v40 = vmul.f32 -1.442695, %v1014_v28  ;;  %v2456_v41 = vmul.f32 -1.442695, %v1111_v35 }
 0x93e   :  { %3083 = vtanh.f32 %v1111_v35 }
 0x93f   :  { %3085 = vpow2.f32 %v2454_v40 }
 0x940   :  { %3087 = vpow2.f32 %v2456_v41 }
 0x947   :  { %v3082_v38 = vpop.eup %3081 }
 0x948   :  { %v3084_v39 = vpop.eup %3083  ;;  %1024 = vrot.lane.b32.xlu0 %v3082_v38, %s3200_s16 }
 0x949   :  { %1121 = vrot.lane.b32.xlu1 %v3084_v39, %s3200_s16  ;;  %v3086_v50 = vpop.eup %3085 }
 0x94a   :  { %v3088_v44 = vpop.eup %3087  ;;  %v1018_v45 = vadd.f32 1.0, %v3086_v50 }
 0x94b   :  { %v1115_v46 = vadd.f32 1.0, %v3088_v44 }
 0x94c   :  { %3089 = vrcp.f32 %v1018_v45 }
 0x94d   :  { %3091 = vrcp.f32 %v1115_v46 }
 0x956   :  { %v3090_v47 = vpop.eup %3089 }
 0x957   :  { %v3092_v49 = vpop.eup %3091  ;;  %v1022_v59 = vmul.f32 %v3090_v47, %v3459_v14 }
 0x958   :  { %v1119_v61 = vmul.f32 %v3092_v49, %v3463_v17 }
 0x9ba   :  { %v1025_v48 = vpop.permute.xlu0 %1024 }
 0x9bb   :  { %v1122_v54 = vpop.permute.xlu1 %1121  ;;  %v1027_v56 = vmul.f32 %v3090_v47, %v1025_v48 }
 0x9bc   :  { %v1124_v58 = vmul.f32 %v3092_v49, %v1122_v54 }
 0x9bd   :  { %1029 = vrot.lane.b32.xlu0 %v1027_v56, %s3200_s16 }
 0x9be   :  { %1126 = vrot.lane.b32.xlu1 %v1124_v58, %s3200_s16 }
 0xa2f   :  { %v1030_v62 = vpop.permute.xlu0 %1029 }
 0xa30   :  { %v1127_v63 = vpop.permute.xlu1 %1126  ;;  %v3500_v0 = vadd.f32 %v1030_v62, %v1022_v59 }
 0xa31   :  { %v3502_v3 = vadd.f32 %v1127_v63, %v1119_v61 }
 0xa32   :  { %3093 = vtanh.f32 %v3500_v0 }
 0xa33   :  { %3095 = vtanh.f32 %v3502_v3 }
 0xa3c   :  { %v3094_v51 = vpop.eup %3093 }
 0xa3d   :  { %v3096_v4 = vpop.eup %3095  ;;  %1035 = vrot.lane.b32.xlu0 %v3094_v51, %s3200_s16  ;;  %v185_v51 = vadd.f32 %v3385_v52, %v3310_v13 }
 0xa3e   :  { %1132 = vrot.lane.b32.xlu1 %v3096_v4, %s3200_s16 }
 0xaaf   :  { %v1036_v5 = vpop.permute.xlu0 %1035 }
 0xab0   :  { %v1133_v7 = vpop.permute.xlu1 %1132  ;;  %v1038_v8 = vmul.f32 %v3090_v47, %v1036_v5 }
 0xab1   :  { %v1135_v9 = vmul.f32 %v3092_v49, %v1133_v7 }
 0xab2   :  { %1137 = vrot.lane.b32.xlu0 %v1038_v8, %s3201_s0 }
 0xab3   :  { %1212 = vrot.lane.b32.xlu1 %v1135_v9, %s3201_s0 }
 0xb24   :  { %v1138_v10 = vpop.permute.xlu0 %1137 }
 0xb25   :  { %v1213_v12 = vpop.permute.xlu1 %1212  ;;  %2744 = vmatmul.mubr.msk.f32.vlgmr.msra.gmra.mrb[16].mxu0 %vm220_vm3, %v1138_v10 }
 0xb26   :  { %2755 = vmatmul.mubr.msk.f32.vlgmr.msra.gmra.mrb[12].mxu1 %vm220_vm3, %v1213_v12  ;;  %2963 = vmatpush3.bf16.msra.mxu0 %v3279_v6 }
 0xb27   :  { %2964 = vmatprep.subr.bf16.mxu0 %v3197_v1  ;;  %2765 = vmatprep.mubr.msk.f32.mxu0 %vm3198_vm0, %v3199_v2 }
 0xb28   :  { %2969 = vmatpush3.bf16.msra.mxu1 %v3332_v36  ;;  %2776 = vmatprep.mubr.msk.f32.mxu1 %vm3198_vm0, %v3199_v2 }
 0xb29   :  { %2970 = vmatprep.subr.bf16.mxu1 %v3197_v1 }
 0xb2a   :  { %2966 = vmatpush3.bf16.msra.mxu0 %v3296_v11 }
 0xb2b   :  { %2973 = vmatprep.subr.bf16.mxu0 %v3197_v1 }
 0xb2c   :  { %2972 = vmatpush3.bf16.msra.mxu1 %v3347_v42 }
 0xb2d   :  { %2766 = vmatmul.mubr.msk.f32.vlgmr.msra.gmra.mrb[18].mxu0 %vm220_vm3, %v1213_v12  ;;  %2979 = vmatprep.subr.bf16.mxu1 %v3197_v1 }
 0xb2e   :  { %2975 = vmatpush3.bf16.msra.mxu0 %v3324_v32  ;;  %2787 = vmatprep.mubr.msk.f32.mxu0 %vm3198_vm0, %v3199_v2 }
 0xb2f   :  { %2976 = vmatprep.subr.bf16.mxu0 %v3197_v1 }
 0xb32   :  { %2978 = vmatpush3.bf16.msra.mxu0 %v3349_v43 }
 0xb33   :  { %2985 = vmatprep.subr.bf16.mxu0 %v3197_v1 }
 0xbf8   :  { %v1207_v14 = vpop.f32.mrb[16].mxu0 }
 0xbf9   :  { %v1282_v15 = vpop.f32.mrb[12].mxu1  ;;  %v2745_v16 = vpop.f32.mrb[17].mxu0 }
 0xbfa   :  { %v1283_v17 = vadd.f32 %v1282_v15, %v1207_v14  ;;  %v2756_v18 = vpop.f32.mrb[13].mxu1 }
 0xbfc   :  { %v1286_v19 = vadd.f32 %v3412_v60, %v1283_v17 }
 0xbfe   :  { %3097 = vtanh.f32 %v1286_v19  ;;  %v2459_v26 = vmul.f32 -1.442695, %v1286_v19 }
 0xc00   :  { %v1379_v21 = vpop.f32.mrb[18].mxu0 }
 0xc01   :  { %v1383_v22 = vadd.f32 %v1379_v21, %v180_v20  ;;  %v2767_v23 = vpop.f32.mrb[19].mxu0 }
 0xc03   :  { %3099 = vtanh.f32 %v1383_v22  ;;  %v2461_v27 = vmul.f32 -1.442695, %v1383_v22 }
 0xc04   :  { %3101 = vpow2.f32 %v2459_v26 }
 0xc05   :  { %3103 = vpow2.f32 %v2461_v27 }
 0xc08   :  { %v3098_v24 = vpop.eup %3097 }
 0xc09   :  { %1296 = vrot.lane.b32.xlu0 %v3098_v24, %s3200_s16 }
 0xc0d   :  { %v3100_v25 = vpop.eup %3099 }
 0xc0e   :  { %1393 = vrot.lane.b32.xlu1 %v3100_v25, %s3200_s16  ;;  %v3102_v29 = vpop.eup %3101 }
 0xc0f   :  { %v1290_v30 = vadd.f32 1.0, %v3102_v29  ;;  %v3104_v31 = vpop.eup %3103 }
 0xc10   :  { %v1387_v33 = vadd.f32 1.0, %v3104_v31 }
 0xc11   :  { %3105 = vrcp.f32 %v1290_v30 }
 0xc12   :  { %3107 = vrcp.f32 %v1387_v33 }
 0xc1b   :  { %v3106_v53 = vpop.eup %3105 }
 0xc1c   :  { %v3108_v35 = vpop.eup %3107  ;;  %v1294_v39 = vmul.f32 %v3106_v53, %v3500_v0 }
 0xc1d   :  { %v1391_v50 = vmul.f32 %v3108_v35, %v3502_v3 }
 0xc7b   :  { %v1297_v34 = vpop.permute.xlu0 %1296 }
 0xc7c   :  { %v1299_v28 = vmul.f32 %v3106_v53, %v1297_v34 }
 0xc7e   :  { %1301 = vrot.lane.b32.xlu0 %v1299_v28, %s3200_s16 }
 0xc80   :  { %v1394_v37 = vpop.permute.xlu1 %1393 }
 0xc81   :  { %v1396_v38 = vmul.f32 %v3108_v35, %v1394_v37 }
 0xc83   :  { %1398 = vrot.lane.b32.xlu1 %v1396_v38, %s3200_s16 }
 0xcf0   :  { %v1302_v40 = vpop.permute.xlu0 %1301 }
 0xcf1   :  { %v3539_v41 = vadd.f32 %v1302_v40, %v1294_v39 }
 0xcf3   :  { %3109 = vtanh.f32 %v3539_v41 }
 0xcf5   :  { %v1399_v44 = vpop.permute.xlu1 %1398 }
 0xcf6   :  { %v3543_v45 = vadd.f32 %v1399_v44, %v1391_v50 }
 0xcf8   :  { %3111 = vtanh.f32 %v3543_v45 }
 0xcfd   :  { %v3110_v46 = vpop.eup %3109 }
 0xcfe   :  { %1307 = vrot.lane.b32.xlu0 %v3110_v46, %s3200_s16  ;;  %v190_v46 = vadd.f32 %v3310_v13, %v3391_v57 }
 0xd02   :  { %v3112_v47 = vpop.eup %3111 }
 0xd03   :  { %1404 = vrot.lane.b32.xlu1 %v3112_v47, %s3200_s16 }
 0xd70   :  { %v1308_v48 = vpop.permute.xlu0 %1307 }
 0xd71   :  { %v1310_v49 = vmul.f32 %v3106_v53, %v1308_v48 }
 0xd73   :  { %1409 = vrot.lane.b32.xlu0 %v1310_v49, %s3201_s0 }
 0xd75   :  { %v1405_v54 = vpop.permute.xlu1 %1404 }
 0xd76   :  { %v1407_v56 = vmul.f32 %v3108_v35, %v1405_v54 }
 0xd78   :  { %1484 = vrot.lane.b32.xlu1 %v1407_v56, %s3201_s0 }
 0xde5   :  { %v1410_v58 = vpop.permute.xlu0 %1409 }
 0xde6   :  { %2777 = vmatmul.mubr.msk.f32.vlgmr.msra.gmra.mrb[14].mxu1 %vm220_vm3, %v1410_v58 }
 0xde7   :  { %2981 = vmatpush3.bf16.msra.mxu1 %v3279_v6  ;;  %2798 = vmatprep.mubr.msk.f32.mxu1 %vm3198_vm0, %v3199_v2 }
 0xde8   :  { %2982 = vmatprep.subr.bf16.mxu1 %v3197_v1 }
 0xdea   :  { %v1485_v59 = vpop.permute.xlu1 %1484 }
 0xdeb   :  { %2984 = vmatpush3.bf16.msra.mxu1 %v3296_v11  ;;  %2788 = vmatmul.mubr.msk.f32.vlgmr.msra.gmra.mrb[20].mxu0 %vm220_vm3, %v1485_v59 }
 0xdec   :  { %2987 = vmatpush3.bf16.msra.mxu0 %v3332_v36  ;;  %2991 = vmatprep.subr.bf16.mxu1 %v3197_v1 }
 0xded   :  { %2988 = vmatprep.subr.bf16.mxu0 %v3197_v1  ;;  %2809 = vmatprep.mubr.msk.f32.mxu0 %vm3198_vm0, %v3199_v2 }
 0xdee   :  { %2799 = vmatmul.mubr.msk.f32.vlgmr.msra.gmra.mrb[16].mxu1 %vm220_vm3, %v1485_v59 }
 0xdef   :  { %2993 = vmatpush3.bf16.msra.mxu1 %v3324_v32  ;;  %2820 = vmatprep.mubr.msk.f32.mxu1 %vm3198_vm0, %v3199_v2 }
 0xdf0   :  { %2990 = vmatpush3.bf16.msra.mxu0 %v3347_v42  ;;  %2994 = vmatprep.subr.bf16.mxu1 %v3197_v1 }
 0xdf1   :  { %2997 = vmatprep.subr.bf16.mxu0 %v3197_v1 }
 0xdf3   :  { %2996 = vmatpush3.bf16.msra.mxu1 %v3349_v43 }
 0xdf4   :  { %3003 = vmatprep.subr.bf16.mxu1 %v3197_v1 }
 0xeb9   :  { %v1479_v61 = vpop.f32.mrb[14].mxu1 }
 0xeba   :  { %v2778_v62 = vpop.f32.mrb[15].mxu1 }
 0xebe   :  { %v1554_v63 = vpop.f32.mrb[20].mxu0 }
 0xebf   :  { %v1555_v0 = vadd.f32 %v1554_v63, %v1479_v61  ;;  %v2789_v3 = vpop.f32.mrb[21].mxu0 }
 0xec1   :  { %v1558_v4 = vadd.f32 %v3412_v60, %v1555_v0  ;;  %v1651_v5 = vpop.f32.mrb[16].mxu1 }
 0xec2   :  { %v1655_v7 = vadd.f32 %v1651_v5, %v185_v51  ;;  %v2800_v8 = vpop.f32.mrb[17].mxu1 }
 0xec3   :  { %3113 = vtanh.f32 %v1558_v4  ;;  %v2464_v12 = vmul.f32 -1.442695, %v1558_v4 }
 0xec4   :  { %3115 = vtanh.f32 %v1655_v7  ;;  %v2466_v14 = vmul.f32 -1.442695, %v1655_v7 }
 0xec5   :  { %3117 = vpow2.f32 %v2464_v12 }
 0xec6   :  { %3119 = vpow2.f32 %v2466_v14 }
 0xecd   :  { %v3114_v9 = vpop.eup %3113 }
 0xece   :  { %v3116_v10 = vpop.eup %3115  ;;  %1568 = vrot.lane.b32.xlu0 %v3114_v9, %s3200_s16 }
 0xecf   :  { %1665 = vrot.lane.b32.xlu1 %v3116_v10, %s3200_s16  ;;  %v3118_v15 = vpop.eup %3117 }
 0xed0   :  { %v3120_v16 = vpop.eup %3119  ;;  %v1562_v52 = vadd.f32 1.0, %v3118_v15 }
 0xed1   :  { %v1659_v17 = vadd.f32 1.0, %v3120_v16 }
 0xed2   :  { %3121 = vrcp.f32 %v1562_v52 }
 0xed3   :  { %3123 = vrcp.f32 %v1659_v17 }
 0xedc   :  { %v3122_v18 = vpop.eup %3121 }
 0xedd   :  { %v3124_v20 = vpop.eup %3123  ;;  %v1566_v24 = vmul.f32 %v3122_v18, %v3539_v41 }
 0xede   :  { %v1663_v25 = vmul.f32 %v3124_v20, %v3543_v45 }
 0xf40   :  { %v1569_v19 = vpop.permute.xlu0 %1568 }
 0xf41   :  { %v1666_v21 = vpop.permute.xlu1 %1665  ;;  %v1571_v22 = vmul.f32 %v3122_v18, %v1569_v19 }
 0xf42   :  { %v1668_v23 = vmul.f32 %v3124_v20, %v1666_v21 }
 0xf43   :  { %1573 = vrot.lane.b32.xlu0 %v1571_v22, %s3200_s16 }
 0xf44   :  { %1670 = vrot.lane.b32.xlu1 %v1668_v23, %s3200_s16 }
 0xfb5   :  { %v1574_v26 = vpop.permute.xlu0 %1573 }
 0xfb6   :  { %v1671_v27 = vpop.permute.xlu1 %1670  ;;  %v3580_v29 = vadd.f32 %v1574_v26, %v1566_v24  ;;  %v3169_v24 = vld [vmem:[%s3682_s3] ss:$0 sm:$0xff] }
 0xfb7   :  { %v3582_v30 = vadd.f32 %v1671_v27, %v1663_v25 }
 0xfb8   :  { %3125 = vtanh.f32 %v3580_v29 }
 0xfb9   :  { %3127 = vtanh.f32 %v3582_v30 }
 0xfc2   :  { %v3126_v31 = vpop.eup %3125 }
 0xfc3   :  { %v3128_v33 = vpop.eup %3127  ;;  %1579 = vrot.lane.b32.xlu0 %v3126_v31, %s3200_s16 }
 0xfc4   :  { %1676 = vrot.lane.b32.xlu1 %v3128_v33, %s3200_s16 }
0x1035   :  { %v1580_v53 = vpop.permute.xlu0 %1579 }
0x1036   :  { %v1677_v34 = vpop.permute.xlu1 %1676  ;;  %v1582_v28 = vmul.f32 %v3122_v18, %v1580_v53 }
0x1037   :  { %v1679_v35 = vmul.f32 %v3124_v20, %v1677_v34 }
0x1038   :  { %1681 = vrot.lane.b32.xlu0 %v1582_v28, %s3201_s0 }
0x1039   :  { %1756 = vrot.lane.b32.xlu1 %v1679_v35, %s3201_s0 }
0x10aa   :  { %v1682_v37 = vpop.permute.xlu0 %1681 }
0x10ab   :  { %v1757_v38 = vpop.permute.xlu1 %1756  ;;  %2810 = vmatmul.mubr.msk.f32.vlgmr.msra.gmra.mrb[22].mxu0 %vm220_vm3, %v1682_v37 }
0x10ac   :  { %2821 = vmatmul.mubr.msk.f32.vlgmr.msra.gmra.mrb[18].mxu1 %vm220_vm3, %v1757_v38  ;;  %2999 = vmatpush3.bf16.msra.mxu0 %v3279_v6 }
0x10ad   :  { %3000 = vmatprep.subr.bf16.mxu0 %v3197_v1  ;;  %2831 = vmatprep.mubr.msk.f32.mxu0 %vm3198_vm0, %v3199_v2 }
0x10ae   :  { %3005 = vmatpush3.bf16.msra.mxu1 %v3332_v36  ;;  %2842 = vmatprep.mubr.msk.f32.mxu1 %vm3198_vm0, %v3199_v2 }
0x10af   :  { %3006 = vmatprep.subr.bf16.mxu1 %v3197_v1 }
0x10b0   :  { %3002 = vmatpush3.bf16.msra.mxu0 %v3296_v11 }
0x10b1   :  { %3009 = vmatprep.subr.bf16.mxu0 %v3197_v1 }
0x10b2   :  { %3008 = vmatpush3.bf16.msra.mxu1 %v3347_v42 }
0x10b3   :  { %2832 = vmatmul.mubr.msk.f32.vlgmr.msra.gmra.mrb[24].mxu0 %vm220_vm3, %v1757_v38  ;;  %3015 = vmatprep.subr.bf16.mxu1 %v3197_v1 }
0x10b4   :  { %3011 = vmatpush3.bf16.msra.mxu0 %v3324_v32  ;;  %2853 = vmatprep.mubr.msk.f32.mxu0 %vm3198_vm0, %v3199_v2 }
0x10b5   :  { %3012 = vmatprep.subr.bf16.mxu0 %v3197_v1 }
0x10b8   :  { %3014 = vmatpush3.bf16.msra.mxu0 %v3349_v43 }
0x10b9   :  { %3021 = vmatprep.subr.bf16.mxu0 %v3197_v1 }
0x117e   :  { %v1751_v39 = vpop.f32.mrb[22].mxu0 }
0x117f   :  { %v1826_v40 = vpop.f32.mrb[18].mxu1  ;;  %v2811_v41 = vpop.f32.mrb[23].mxu0 }
0x1180   :  { %v1827_v50 = vadd.f32 %v1826_v40, %v1751_v39  ;;  %v2822_v44 = vpop.f32.mrb[19].mxu1 }
0x1182   :  { %v1830_v45 = vadd.f32 %v3412_v60, %v1827_v50 }
0x1184   :  { %3129 = vtanh.f32 %v1830_v45  ;;  %v2469_v58 = vmul.f32 -1.442695, %v1830_v45 }
0x1186   :  { %v1923_v47 = vpop.f32.mrb[24].mxu0 }
0x1187   :  { %v1927_v48 = vadd.f32 %v1923_v47, %v190_v46  ;;  %v2833_v49 = vpop.f32.mrb[25].mxu0 }
0x1189   :  { %3131 = vtanh.f32 %v1927_v48  ;;  %v2471_v59 = vmul.f32 -1.442695, %v1927_v48 }
0x118a   :  { %3133 = vpow2.f32 %v2469_v58 }
0x118b   :  { %3135 = vpow2.f32 %v2471_v59 }
0x118e   :  { %v3130_v54 = vpop.eup %3129 }
0x118f   :  { %1840 = vrot.lane.b32.xlu0 %v3130_v54, %s3200_s16 }
0x1193   :  { %v3132_v56 = vpop.eup %3131 }
0x1194   :  { %1937 = vrot.lane.b32.xlu1 %v3132_v56, %s3200_s16  ;;  %v3134_v61 = vpop.eup %3133 }
0x1195   :  { %v1834_v62 = vadd.f32 1.0, %v3134_v61  ;;  %v3136_v63 = vpop.eup %3135 }
0x1196   :  { %v1931_v0 = vadd.f32 1.0, %v3136_v63 }
0x1197   :  { %3137 = vrcp.f32 %v1834_v62 }
0x1198   :  { %3139 = vrcp.f32 %v1931_v0 }
0x11a1   :  { %v3138_v13 = vpop.eup %3137 }
0x11a2   :  { %v3140_v51 = vpop.eup %3139  ;;  %v1838_v7 = vmul.f32 %v3138_v13, %v3580_v29 }
0x11a3   :  { %v1935_v10 = vmul.f32 %v3140_v51, %v3582_v30 }
0x1201   :  { %v1841_v57 = vpop.permute.xlu0 %1840 }
0x1202   :  { %v1843_v3 = vmul.f32 %v3138_v13, %v1841_v57 }
0x1204   :  { %1845 = vrot.lane.b32.xlu0 %v1843_v3, %s3200_s16 }
0x1206   :  { %v1938_v4 = vpop.permute.xlu1 %1937 }
0x1207   :  { %v1940_v5 = vmul.f32 %v3140_v51, %v1938_v4 }
0x1209   :  { %1942 = vrot.lane.b32.xlu1 %v1940_v5, %s3200_s16 }
0x1276   :  { %v1846_v8 = vpop.permute.xlu0 %1845 }
0x1277   :  { %v3619_v9 = vadd.f32 %v1846_v8, %v1838_v7 }
0x1279   :  { %3141 = vtanh.f32 %v3619_v9 }
0x127b   :  { %v1943_v12 = vpop.permute.xlu1 %1942 }
0x127c   :  { %v3623_v14 = vadd.f32 %v1943_v12, %v1935_v10  ;;  %v2480_v10 = vld [vmem:[%s3686_s7] ss:$0 sm:$0xff] }
0x127e   :  { %3143 = vtanh.f32 %v3623_v14 }
0x1283   :  { %v3142_v15 = vpop.eup %3141 }
0x1284   :  { %1851 = vrot.lane.b32.xlu0 %v3142_v15, %s3200_s16 }
0x1288   :  { %v3144_v16 = vpop.eup %3143 }
0x1289   :  { %1948 = vrot.lane.b32.xlu1 %v3144_v16, %s3200_s16 }
0x12f6   :  { %v1852_v52 = vpop.permute.xlu0 %1851 }
0x12f7   :  { %v1854_v17 = vmul.f32 %v3138_v13, %v1852_v52 }
0x12f9   :  { %1953 = vrot.lane.b32.xlu0 %v1854_v17, %s3201_s0 }
0x12fb   :  { %v1949_v18 = vpop.permute.xlu1 %1948 }
0x12fc   :  { %v1951_v19 = vmul.f32 %v3140_v51, %v1949_v18 }
0x12fe   :  { %2028 = vrot.lane.b32.xlu1 %v1951_v19, %s3201_s0 }
0x136b   :  { %v1954_v20 = vpop.permute.xlu0 %1953 }
0x136c   :  { %2843 = vmatmul.mubr.msk.f32.vlgmr.msra.gmra.mrb[20].mxu1 %vm220_vm3, %v1954_v20 }
0x136d   :  { %3017 = vmatpush3.bf16.msra.mxu1 %v3279_v6  ;;  %2864 = vmatprep.mubr.msk.f32.mxu1 %vm3198_vm0, %v3199_v2 }
0x136e   :  { %3018 = vmatprep.subr.bf16.mxu1 %v3197_v1 }
0x1370   :  { %v2029_v21 = vpop.permute.xlu1 %2028 }
0x1371   :  { %3020 = vmatpush3.bf16.msra.mxu1 %v3296_v11  ;;  %2854 = vmatmul.mubr.msk.f32.vlgmr.msra.gmra.mrb[26].mxu0 %vm220_vm3, %v2029_v21 }
0x1372   :  { %3027 = vmatprep.subr.bf16.mxu1 %v3197_v1  ;;  %3023 = vmatpush3.bf16.msra.mxu0 %v3332_v36 }
0x1373   :  { %3024 = vmatprep.subr.bf16.mxu0 %v3197_v1  ;;  %2875 = vmatprep.mubr.msk.f32.mxu0 %vm3198_vm0, %v3199_v2 }
0x1374   :  { %2865 = vmatmul.mubr.msk.f32.vlgmr.msra.gmra.mrb[22].mxu1 %vm220_vm3, %v2029_v21  ;;  %v2481_v21 = vld [vmem:[#allocation3] ss:$0 sm:$0xff] }
0x1375   :  { %3029 = vmatpush3.bf16.msra.mxu1 %v3324_v32  ;;  %2886 = vmatprep.mubr.msk.f32.mxu1 %vm3198_vm0, %v3199_v2  ;;  %v195_v32 = vadd.f32 %v3169_v24, %v3389_v55 }
0x1376   :  { %3030 = vmatprep.subr.bf16.mxu1 %v3197_v1  ;;  %3026 = vmatpush3.bf16.msra.mxu0 %v3347_v42 }
0x1379   :  { %3032 = vmatpush3.bf16.msra.mxu1 %v3349_v43 }
0x143f   :  { %v2023_v6 = vpop.f32.mrb[20].mxu1 }
0x1440   :  { %v2844_v11 = vpop.f32.mrb[21].mxu1 }
0x1444   :  { %v2098_v36 = vpop.f32.mrb[26].mxu0 }
0x1445   :  { %v2099_v22 = vadd.f32 %v2098_v36, %v2023_v6  ;;  %v2855_v23 = vpop.f32.mrb[27].mxu0 }
0x1447   :  { %v2102_v25 = vadd.f32 %v3412_v60, %v2099_v22  ;;  %v2195_v2 = vpop.f32.mrb[22].mxu1 }
0x1448   :  { %v2199_v26 = vadd.f32 %v2195_v2, %v195_v32  ;;  %v2866_v1 = vpop.f32.mrb[23].mxu1 }
0x1449   :  { %3145 = vtanh.f32 %v2102_v25  ;;  %v2474_v27 = vmul.f32 -1.442695, %v2102_v25 }
0x144a   :  { %3147 = vtanh.f32 %v2199_v26  ;;  %v2476_v29 = vmul.f32 -1.442695, %v2199_v26 }
0x144b   :  { %3149 = vpow2.f32 %v2474_v27 }
0x144c   :  { %3151 = vpow2.f32 %v2476_v29 }
0x1453   :  { %v3146_v42 = vpop.eup %3145 }
0x1454   :  { %v3148_v43 = vpop.eup %3147  ;;  %2112 = vrot.lane.b32.xlu0 %v3146_v42, %s3200_s16 }
0x1455   :  { %2209 = vrot.lane.b32.xlu1 %v3148_v43, %s3200_s16  ;;  %v3150_v30 = vpop.eup %3149 }
0x1456   :  { %v3152_v31 = vpop.eup %3151  ;;  %v2106_v55 = vadd.f32 1.0, %v3150_v30 }
0x1457   :  { %v2203_v33 = vadd.f32 1.0, %v3152_v31 }
0x1458   :  { %3153 = vrcp.f32 %v2106_v55 }
0x1459   :  { %3155 = vrcp.f32 %v2203_v33 }
0x1462   :  { %v3154_v53 = vpop.eup %3153 }
0x1463   :  { %v3156_v28 = vpop.eup %3155  ;;  %v2110_v39 = vmul.f32 %v3154_v53, %v3619_v9 }
0x1464   :  { %v2207_v40 = vmul.f32 %v3156_v28, %v3623_v14 }
0x14c6   :  { %v2113_v34 = vpop.permute.xlu0 %2112 }
0x14c7   :  { %v2210_v35 = vpop.permute.xlu1 %2209  ;;  %v2115_v37 = vmul.f32 %v3154_v53, %v2113_v34 }
0x14c8   :  { %v2212_v38 = vmul.f32 %v3156_v28, %v2210_v35 }
0x14c9   :  { %2117 = vrot.lane.b32.xlu0 %v2115_v37, %s3200_s16 }
0x14ca   :  { %2214 = vrot.lane.b32.xlu1 %v2212_v38, %s3200_s16 }
0x153b   :  { %v2118_v41 = vpop.permute.xlu0 %2117 }
0x153c   :  { %v2215_v50 = vpop.permute.xlu1 %2214  ;;  %v2120_v44 = vadd.f32 %v2118_v41, %v2110_v39 }
0x153d   :  { %v2217_v45 = vadd.f32 %v2215_v50, %v2207_v40 }
0x153e   :  { %3157 = vtanh.f32 %v2120_v44 }
0x153f   :  { %3159 = vtanh.f32 %v2217_v45 }
0x1548   :  { %v3158_v46 = vpop.eup %3157 }
0x1549   :  { %v3160_v47 = vpop.eup %3159  ;;  %2123 = vrot.lane.b32.xlu0 %v3158_v46, %s3200_s16 }
0x154a   :  { %2220 = vrot.lane.b32.xlu1 %v3160_v47, %s3200_s16 }
0x15bb   :  { %v2124_v48 = vpop.permute.xlu0 %2123 }
0x15bc   :  { %v2221_v49 = vpop.permute.xlu1 %2220  ;;  %v2126_v54 = vmul.f32 %v3154_v53, %v2124_v48 }
0x15bd   :  { %v2223_v56 = vmul.f32 %v3156_v28, %v2221_v49 }
0x15be   :  { %2225 = vrot.lane.b32.xlu0 %v2126_v54, %s3201_s0 }
0x15bf   :  { %2300 = vrot.lane.b32.xlu1 %v2223_v56, %s3201_s0 }
0x1630   :  { %v2226_v58 = vpop.permute.xlu0 %2225 }
0x1631   :  { %v2301_v59 = vpop.permute.xlu1 %2300  ;;  %2876 = vmatmul.mubr.msk.f32.vlgmr.msra.gmra.mrb[28].mxu0 %vm220_vm3, %v2226_v58 }
0x1632   :  { %2887 = vmatmul.mubr.msk.f32.vlgmr.msra.gmra.mrb[24].mxu1 %vm220_vm3, %v2301_v59 }
0x1704   :  { %v2295_v61 = vpop.f32.mrb[28].mxu0 }
0x1705   :  { %v2370_v62 = vpop.f32.mrb[24].mxu1  ;;  %v2877_v63 = vpop.f32.mrb[29].mxu0 }
0x1706   :  { %v2371_v0 = vadd.f32 %v2370_v62, %v2295_v61  ;;  %v2888_v13 = vpop.f32.mrb[25].mxu1 }
0x1708   :  { %v2374_v57 = vadd.f32 %v3412_v60, %v2371_v0 }
0x170a   :  { %3161 = vtanh.f32 %v2374_v57  ;;  %v2479_v51 = vmul.f32 -1.442695, %v2374_v57 }
0x170c   :  { %3163 = vpow2.f32 %v2479_v51 }
0x1714   :  { %v3162_v3 = vpop.eup %3161 }
0x1715   :  { %2384 = vrot.lane.b32.xlu0 %v3162_v3, %s3200_s16 }
0x1716   :  { %v3164_v4 = vpop.eup %3163 }
0x1717   :  { %v2378_v5 = vadd.f32 1.0, %v3164_v4 }
0x1719   :  { %3165 = vrcp.f32 %v2378_v5 }
0x1723   :  { %v3166_v7 = vpop.eup %3165 }
0x1724   :  { %v2382_v60 = vmul.f32 %v3166_v7, %v2120_v44 }
0x1787   :  { %v2385_v8 = vpop.permute.xlu0 %2384 }
0x1788   :  { %v2387_v9 = vmul.f32 %v3166_v7, %v2385_v8 }
0x178a   :  { %2389 = vrot.lane.b32.xlu1 %v2387_v9, %s3200_s16 }
0x178e   :  { %2405 = vrot.lane.b32.xlu1 %v2480_v10, %s3201_s0 }
0x17fc   :  { %v2390_v12 = vpop.permute.xlu1 %2389 }
0x17fd   :  { %v2392_v14 = vadd.f32 %v2390_v12, %v2382_v60 }
0x17ff   :  { %3167 = vtanh.f32 %v2392_v14 }
0x1800   :  { %v2406_v52 = vpop.permute.xlu1 %2405 }
0x1809   :  { %v3168_v15 = vpop.eup %3167 }
0x180a   :  { %2395 = vrot.lane.b32.xlu0 %v3168_v15, %s3200_s16 }
0x187c   :  { %v2396_v16 = vpop.permute.xlu0 %2395 }
0x187d   :  { %v2398_v17 = vmul.f32 %v3166_v7, %v2396_v16 }
0x187f   :  { %v2408_v18 = vmul.f32 %v2406_v52, %v2398_v17 }
0x1881   :  { %2410 = vrot.lane.b32.xlu0 %v2408_v18, %s3201_s0 }
0x18f3   :  { %v2411_v19 = vpop.permute.xlu0 %2410 }
0x18f4   :  { %v2413_v20 = vsel %vm220_vm3, %v2411_v19, 0.0 }
0x18f5   :  { %2414 = vadd.xlane.f32.xlu1 %v2413_v20 }
0x1982   :  { %v2415_v6 = vpop.xlane.xlu1 %2414 }
0x1983   :  { %v2423_v11 = vadd.f32 %v2481_v21, %v2415_v6 }
0x1985   :  { %2425 = vst.msk [vmem:[%s3688_s9] sm:$0xff] %vm2424_vm4, %v2423_v11 }
0x1986   :  { %2430 = vsyncpa [#allocation5], 1 }

</bundles_post_ra>
